<compile_context>
chip_gen: v5e
topology: v5e:2x2
jax: 0.10.0
libtpu: 0.0.40
codegen_flags: <defaults>
</compile_context>

<pallas_src>
import functools

import jax
import jax.numpy as jnp
import numpy as np
from jax import lax
from jax.experimental import pallas as pl
from jax.experimental.pallas import tpu as pltpu


# ----------------------------------------------------------------------------
# Pallas kernel: one block of Bblk batch rows per grid step.
# ----------------------------------------------------------------------------
def _dqn_kernel(w_obs_ref, fea_emb_ref, nei_mask_ref, q0_ref,
                w1_ref, b1_ref, w2_ref, b2_ref, wc_ref, wq_ref, bq_ref,
                move_ref, *, seq_len, nei_size):
    f32 = jnp.float32
    bf16 = jnp.bfloat16
    S, N = seq_len, nei_size
    Bb = w_obs_ref.shape[0]
    D = fea_emb_ref.shape[-1]

    # Weights (tiny; already bf16 where used as MXU operands).
    w1_q = w1_ref[...]                                   # [D, D]   bf16
    b1 = b1_ref[...]                                     # [1, D]   f32
    w2_q = w2_ref[...]                                   # [2D, D]  bf16
    b2 = b2_ref[...]                                     # [1, D]   f32
    w2a_q, w2b_q = w2_q[:D, :], w2_q[D:, :]              # cat([nf, q])@W2 == nf@W2a + q@W2b
    wq_q = wq_ref[...]                                   # [3D, D]  bf16
    bq = bq_ref[...]                                     # [1, D]   f32
    # Hoisted once (JAX does not CSE broadcast_in_dim across the unrolled loop).
    wc_b = jnp.broadcast_to(wc_ref[...].reshape(1, 1, D), (Bb, N, D))   # f32

    # ---- query-independent path, hoisted out of the recurrence ----------------
    # nf_all = relu(unit_fea_mlp_1(einsum('b(sn)v,bvd->b(sn)d', w_obs, fea_emb)))
    # pre2   = nf_all @ W2a + b2   (query-dependent half q@W2b is added per step)
    # All MXU operands are bf16 with f32 accumulation (1-pass native MXU).
    wo_q = w_obs_ref[...]                                               # [Bb, S*N, V] bf16
    fe_q = fea_emb_ref[...]                                             # [Bb, V, D]   bf16
    nei = jnp.einsum('bkv,bvd->bkd', wo_q, fe_q,
                     preferred_element_type=f32)                        # [Bb, S*N, D] f32
    nei2 = nei.reshape(Bb * S * N, D)
    nf2 = jnp.maximum(
        jnp.dot(nei2.astype(bf16), w1_q, preferred_element_type=f32) + b1, 0.0)
    # TODO(synk): F.dropout(p=0.9) (training-mode default in the reference module) is
    # applied as identity (inference semantics) here and below.
    pre2_2 = jnp.dot(nf2.astype(bf16), w2a_q, preferred_element_type=f32) + b2
    nf_all = nf2.reshape(Bb, S * N, D)
    pre2 = pre2_2.reshape(Bb, S * N, D)

    q = q0_ref[...]                                                     # [Bb, D] f32
    nei_mask = nei_mask_ref[...]                                        # [Bb, S*N] f32
    iota_n = lax.broadcasted_iota(jnp.int32, (Bb, N), 1)                # lane-major

    cls_steps = []
    for s in range(S):   # S is static & small: fully unrolled serial recurrence
        nf_s = nf_all[:, s * N:(s + 1) * N, :]                          # [Bb, N, D]
        p2_s = pre2[:, s * N:(s + 1) * N, :]                            # [Bb, N, D]

        # h = relu(cat([nf, q]) @ W2 + b2)
        qw = jnp.dot(q.astype(bf16), w2b_q, preferred_element_type=f32)  # [Bb, D]
        h = jnp.maximum(p2_s + qw[:, None, :], 0.0)                      # [Bb, N, D]

        # cls head in f32 on the VPU, kept in [Bb, N] lane layout.  (bc is a
        # per-output constant: argmax is invariant to it -> folded in the wrapper.)
        cls = jnp.sum(h * wc_b, axis=-1)                                 # [Bb, N]
        cls_steps.append(cls)
        # (reg head of the reference module is dead w.r.t. its outputs: not computed.)

        # per-row first-argmax over neighbors (matches jnp/torch argmax semantics)
        mx = jnp.max(cls, axis=-1, keepdims=True)                        # [Bb, 1]
        idx = jnp.min(jnp.where(cls == mx, iota_n, N),
                      axis=-1, keepdims=True)                            # [Bb, 1]
        onehot = (iota_n == idx).astype(f32)                             # [Bb, N]

        pos = jnp.sum(nf_s * onehot[:, :, None], axis=1)                 # [Bb, D]
        neg = jnp.sum(nf_s, axis=1) - pos                                # [Bb, D]

        mask_wo = nei_mask[:, s * N:(s + 1) * N] * (1.0 - onehot)        # mask[pos_idx]=0
        neg_num = jnp.sum(mask_wo, axis=-1, keepdims=True)               # [Bb, 1]
        neg_num = jnp.where(neg_num > 0.0, neg_num, 1.0)
        neg = neg / neg_num

        # query = relu(query_upd_mlp(cat([query, pos, neg]))) -- fused into a single
        # [Bb, 3D] @ [3D, D] MXU push (one push/pop on the serial critical path).
        qcat = jnp.concatenate([q, pos, neg], axis=-1)                   # [Bb, 3D]
        q = jnp.maximum(
            jnp.dot(qcat.astype(bf16), wq_q, preferred_element_type=f32) + bq, 0.0)

    # Single lane-dense store of the whole [Bb, S*N] output block (32 lanes).
    move_ref[...] = jnp.concatenate(cls_steps, axis=-1)


# ----------------------------------------------------------------------------
# Wrapper
# ----------------------------------------------------------------------------
def _pick_batch_block(B, max_block=256, num_cores=2):
    """Largest multiple-of-8 divisor of B, capped at max_block and (when possible) at
    B//num_cores so the batch grid has >= num_cores steps for v7x's two TensorCores.
    Non-multiple-of-8 batches fall back to a single block (Bblk == B keeps the
    (8,128) layout rule satisfied)."""
    if B % 8 != 0:
        return B
    cap = min(max_block, B)
    if B // num_cores >= 8:
        cap = min(cap, (B // num_cores) // 8 * 8)
    for cand in range(cap, 7, -8):
        if B % cand == 0:
            return cand
    return B


def deep_q_net_ivcml_forward(params, query_tok_ids, weight_observe, fea_emb, nei_mask):
    B, S, N, V = weight_observe.shape
    D = fea_emb.shape[-1]
    K = S * N

    # TODO(synk): pretrained BertModel has no in-script Pallas equivalent; replaced by a
    # deterministic token-embedding table.  The token mean-pool runs here in XLA so only
    # the pooled [B, D] query enters the kernel.
    q0 = params["tok_emb"][query_tok_ids].mean(axis=-2).astype(jnp.float32)   # [B, D]

    # HBM-side flattening (free) + bf16 quantization of the dominant DMA inputs and of
    # the MXU weight operands; accumulation stays f32 inside the kernel.
    wo_q = weight_observe.reshape(B, K, V).astype(jnp.bfloat16)
    fe_q = fea_emb.astype(jnp.bfloat16)
    mask_flat = nei_mask.reshape(B, K).astype(jnp.float32)
    w1_q = params["w1"].astype(jnp.bfloat16)
    w2_q = params["w2"].astype(jnp.bfloat16)
    wq_q = params["wq"].astype(jnp.bfloat16)

    Bblk = _pick_batch_block(B)
    grid = (B // Bblk,)

    grid_spec = pltpu.PrefetchScalarGridSpec(
        num_scalar_prefetch=0,
        grid=grid,
        in_specs=[
            pl.BlockSpec((Bblk, K, V), lambda i: (i, 0, 0)),   # weight_observe [B,S*N,V] bf16
            pl.BlockSpec((Bblk, V, D), lambda i: (i, 0, 0)),   # fea_emb bf16
            pl.BlockSpec((Bblk, K), lambda i: (i, 0)),         # nei_mask [B,S*N]
            pl.BlockSpec((Bblk, D), lambda i: (i, 0)),         # pooled query q0
            pl.BlockSpec((D, D), lambda i: (0, 0)),            # W1 (bf16)
            pl.BlockSpec((1, D), lambda i: (0, 0)),            # b1
            pl.BlockSpec((2 * D, D), lambda i: (0, 0)),        # W2 (bf16)
            pl.BlockSpec((1, D), lambda i: (0, 0)),            # b2
            pl.BlockSpec((1, D), lambda i: (0, 0)),            # W_cls^T row (f32, VPU)
            pl.BlockSpec((3 * D, D), lambda i: (0, 0)),        # W_query_upd (bf16)
            pl.BlockSpec((1, D), lambda i: (0, 0)),            # b_query_upd
        ],
        out_specs=pl.BlockSpec((Bblk, K), lambda i: (i, 0)),   # lane-dense [Bblk, S*N]
    )

    move_flat = pl.pallas_call(
        functools.partial(_dqn_kernel, seq_len=S, nei_size=N),
        out_shape=jax.ShapeDtypeStruct((B, K), jnp.float32),
        grid_spec=grid_spec,
        compiler_params=pltpu.CompilerParams(
            # Batch blocks are independent -> shard the grid across TensorCores (v7x).
            dimension_semantics=("parallel",),
        ),
    )(wo_q, fe_q, mask_flat, q0,
      w1_q, params["b1"], w2_q, params["b2"],
      params["wc"].T, wq_q, params["bq"])

    # cls bias folded here (argmax inside the kernel is invariant to it).
    move = move_flat.reshape(B, S, N) + params["bc"][0, 0]
    # Reference bug preserved: reward_pred carries the same cls scores as move_pred.
    return move, move


# ----------------------------------------------------------------------------
# Pure-JAX reference (module-structured; same semantics, for validation)
#
# Matmul operands are rounded to bf16 with f32 accumulation -- the same mixed
# precision the kernel uses on the MXU -- so the discrete argmax recurrence can be
# compared against the kernel at tight tolerance (review correctness concern #2).
# ----------------------------------------------------------------------------
def reference_forward(params, query_tok_ids, weight_observe, fea_emb, nei_mask):
    f32, bf16 = jnp.float32, jnp.bfloat16

    def mm(a, b):   # bf16-operand, f32-accumulate matmul (TPU MXU semantics)
        return jnp.dot(a.astype(bf16), b.astype(bf16), preferred_element_type=f32)

    q = params["tok_emb"][query_tok_ids].mean(axis=-2).astype(f32)       # [B, D]
    nei = jnp.einsum('bsnv,bvd->bsnd',
                     weight_observe.astype(bf16), fea_emb.astype(bf16),
                     preferred_element_type=f32)                          # [B, S, N, D]
    B, S, N, D = nei.shape
    nei = jnp.maximum(
        mm(nei.reshape(-1, D), params["w1"]).reshape(B, S, N, D) + params["b1"], 0.0)
    moves = []
    for s in range(S):
        nf = nei[:, s]                                                   # [B, N, D]
        qrep = jnp.broadcast_to(q[:, None, :], (B, N, D))
        cat = jnp.concatenate([nf, qrep], axis=-1)                       # [B, N, 2D]
        h = jnp.maximum(
            mm(cat.reshape(-1, 2 * D), params["w2"]).reshape(B, N, D) + params["b2"], 0.0)
        # cls head kept ~f32-exact (the kernel computes it as an f32 VPU reduction).
        cls = jnp.einsum('bnd,do->bno', h, params["wc"],
                         precision=lax.Precision.HIGHEST)[..., 0] + params["bc"][0, 0]
        moves.append(cls)
        idx = jnp.argmax(cls, axis=-1)                                   # [B]
        pos = jnp.take_along_axis(nf, idx[:, None, None], axis=1)[:, 0, :]
        neg = nf.sum(axis=1) - pos
        mask = nei_mask[:, s] * (1.0 - jax.nn.one_hot(idx, N, dtype=f32))
        nn_ = mask.sum(axis=-1, keepdims=True)
        nn_ = jnp.where(nn_ > 0.0, nn_, 1.0)
        neg = neg / nn_
        q = jnp.maximum(
            mm(jnp.concatenate([q, pos, neg], axis=-1), params["wq"]) + params["bq"], 0.0)
    move = jnp.stack(moves, axis=1)
    return move, move


# ----------------------------------------------------------------------------
# Deterministic parameter init (synthetic, no checkpoint load)
# ----------------------------------------------------------------------------
def init_params(key, d_fea, vocab):
    ks = jax.random.split(key, 11)
    w = lambda k, shape, s=0.1: jax.random.normal(k, shape, jnp.float32) * s
    return dict(
        tok_emb=w(ks[0], (vocab, d_fea), 1.0),
        w1=w(ks[1], (d_fea, d_fea)), b1=w(ks[2], (1, d_fea)),
        w2=w(ks[3], (2 * d_fea, d_fea)), b2=w(ks[4], (1, d_fea)),
        wc=w(ks[5], (d_fea, 1)), bc=w(ks[6], (1, 1)),
        # reg head exists in the module but its output is unused in forward (reference
        # bug); kept for parameter-count fidelity, not passed to the kernel.
        wr=w(ks[7], (d_fea, 1)), br=w(ks[8], (1, 1)),
        wq=w(ks[9], (3 * d_fea, d_fea)), bq=w(ks[10], (1, d_fea)),
    )


if __name__ == "__main__":
    B, S, N, V, D, T, VOCAB = 2, 4, 8, 16, 32, 8, 100  # alpha/step_num unused in forward

    root = jax.random.PRNGKey(0)
    kp, k1, k2, k3, k4 = jax.random.split(root, 5)
    params = init_params(kp, D, VOCAB)

    query_tok_ids = jax.random.randint(k1, (B, T), 0, VOCAB, dtype=jnp.int32)
    weight_observe = jax.random.normal(k2, (B, S, N, V), jnp.float32)
    fea_emb = jax.random.normal(k3, (B, V, D), jnp.float32)
    nei_mask = (jax.random.uniform(k4, (B, S, N)) > 0.3).astype(jnp.float32)

    move_k, reward_k = deep_q_net_ivcml_forward(
        params, query_tok_ids, weight_observe, fea_emb, nei_mask)
    jax.block_until_ready((move_k, reward_k))

    move_r, reward_r = reference_forward(
        params, query_tok_ids, weight_observe, fea_emb, nei_mask)

    np.testing.assert_allclose(np.asarray(move_k), np.asarray(move_r), rtol=2e-3, atol=2e-3)
    np.testing.assert_allclose(np.asarray(reward_k), np.asarray(reward_r), rtol=2e-3, atol=2e-3)

    print("KERNEL_OK")
</pallas_src>

<mosaic_0001>
module attributes {stable_mosaic.version = 11 : i64} {
  func.func @_dqn_kernel(%arg0: i32, %arg1: memref<2x32x16xbf16, #tpu.memory_space<vmem>>, %arg2: memref<2x16x32xbf16, #tpu.memory_space<vmem>>, %arg3: memref<2x32xf32, #tpu.memory_space<vmem>>, %arg4: memref<2x32xf32, #tpu.memory_space<vmem>>, %arg5: memref<32x32xbf16, #tpu.memory_space<vmem>>, %arg6: memref<1x32xf32, #tpu.memory_space<vmem>>, %arg7: memref<64x32xbf16, #tpu.memory_space<vmem>>, %arg8: memref<1x32xf32, #tpu.memory_space<vmem>>, %arg9: memref<1x32xf32, #tpu.memory_space<vmem>>, %arg10: memref<96x32xbf16, #tpu.memory_space<vmem>>, %arg11: memref<1x32xf32, #tpu.memory_space<vmem>>, %arg12: memref<2x32xf32, #tpu.memory_space<vmem>>) attributes {dimension_semantics = [#tpu.dimension_semantics<parallel>], iteration_bounds = array<i64: 1>, scalar_prefetch = 0 : i64, scratch_operands = 0 : i64, tpu.core_type = #tpu.core_type<tc>, window_params = [{transform_indices = @transform_0, window_bounds = array<i64: 2, 32, 16>}, {transform_indices = @transform_1, window_bounds = array<i64: 2, 16, 32>}, {transform_indices = @transform_2, window_bounds = array<i64: 2, 32>}, {transform_indices = @transform_3, window_bounds = array<i64: 2, 32>}, {pipeline_mode = #tpu.pipeline_mode<synchronous>, transform_indices = @transform_4, window_bounds = array<i64: 32, 32>}, {pipeline_mode = #tpu.pipeline_mode<synchronous>, transform_indices = @transform_5, window_bounds = array<i64: 1, 32>}, {pipeline_mode = #tpu.pipeline_mode<synchronous>, transform_indices = @transform_6, window_bounds = array<i64: 64, 32>}, {pipeline_mode = #tpu.pipeline_mode<synchronous>, transform_indices = @transform_7, window_bounds = array<i64: 1, 32>}, {pipeline_mode = #tpu.pipeline_mode<synchronous>, transform_indices = @transform_8, window_bounds = array<i64: 1, 32>}, {pipeline_mode = #tpu.pipeline_mode<synchronous>, transform_indices = @transform_9, window_bounds = array<i64: 96, 32>}, {pipeline_mode = #tpu.pipeline_mode<synchronous>, transform_indices = @transform_10, window_bounds = array<i64: 1, 32>}, {transform_indices = @transform_11, window_bounds = array<i64: 2, 32>}]} {
    %c0 = arith.constant 0 : index
    %c0_0 = arith.constant 0 : index
    %0 = vector.load %arg5[%c0, %c0_0] : memref<32x32xbf16, #tpu.memory_space<vmem>>, vector<32x32xbf16>
    %c0_1 = arith.constant 0 : index
    %c0_2 = arith.constant 0 : index
    %1 = vector.load %arg6[%c0_1, %c0_2] : memref<1x32xf32, #tpu.memory_space<vmem>>, vector<1x32xf32>
    %c0_3 = arith.constant 0 : index
    %c0_4 = arith.constant 0 : index
    %2 = vector.load %arg7[%c0_3, %c0_4] : memref<64x32xbf16, #tpu.memory_space<vmem>>, vector<64x32xbf16>
    %c0_5 = arith.constant 0 : index
    %c0_6 = arith.constant 0 : index
    %3 = vector.load %arg8[%c0_5, %c0_6] : memref<1x32xf32, #tpu.memory_space<vmem>>, vector<1x32xf32>
    %4 = vector.extract_strided_slice %2 {offsets = [0, 0], sizes = [32, 32], strides = [1, 1]} : vector<64x32xbf16> to vector<32x32xbf16>
    %5 = vector.extract_strided_slice %2 {offsets = [32, 0], sizes = [32, 32], strides = [1, 1]} : vector<64x32xbf16> to vector<32x32xbf16>
    %c0_7 = arith.constant 0 : index
    %c0_8 = arith.constant 0 : index
    %6 = vector.load %arg10[%c0_7, %c0_8] : memref<96x32xbf16, #tpu.memory_space<vmem>>, vector<96x32xbf16>
    %c0_9 = arith.constant 0 : index
    %c0_10 = arith.constant 0 : index
    %7 = vector.load %arg11[%c0_9, %c0_10] : memref<1x32xf32, #tpu.memory_space<vmem>>, vector<1x32xf32>
    %c0_11 = arith.constant 0 : index
    %c0_12 = arith.constant 0 : index
    %8 = vector.load %arg9[%c0_11, %c0_12] : memref<1x32xf32, #tpu.memory_space<vmem>>, vector<1x32xf32>
    %9 = vector.shape_cast %8 : vector<1x32xf32> to vector<1x1x32xf32>
    %10 = vector.shape_cast %9 : vector<1x1x32xf32> to vector<1x1x32xf32>
    %11 = vector.broadcast %10 : vector<1x1x32xf32> to vector<2x8x32xf32>
    %c0_13 = arith.constant 0 : index
    %c0_14 = arith.constant 0 : index
    %c0_15 = arith.constant 0 : index
    %12 = vector.load %arg1[%c0_13, %c0_14, %c0_15] : memref<2x32x16xbf16, #tpu.memory_space<vmem>>, vector<2x32x16xbf16>
    %c0_16 = arith.constant 0 : index
    %c0_17 = arith.constant 0 : index
    %c0_18 = arith.constant 0 : index
    %13 = vector.load %arg2[%c0_16, %c0_17, %c0_18] : memref<2x16x32xbf16, #tpu.memory_space<vmem>>, vector<2x16x32xbf16>
    "tpu.trace_start"() <{level = 10 : i32, message = "bkv,bvd->bkd"}> : () -> ()
    %cst = arith.constant dense<0.000000e+00> : vector<2x32x32xf32>
    %14 = tpu.matmul %12, %13, %cst {dimension_numbers = #tpu.dot_dimension_numbers<[2], [1], [1], [2], [0, 0, 0, 1, 1, 2], [0], [0]>} : vector<2x32x16xbf16>, vector<2x16x32xbf16>, vector<2x32x32xf32> -> vector<2x32x32xf32>
    "tpu.trace_stop"() : () -> ()
    %15 = vector.shape_cast %14 : vector<2x32x32xf32> to vector<64x32xf32>
    %16 = arith.truncf %15 : vector<64x32xf32> to vector<64x32xbf16>
    %cst_19 = arith.constant dense<0.000000e+00> : vector<64x32xf32>
    %17 = tpu.matmul %16, %0, %cst_19 {dimension_numbers = #tpu.dot_dimension_numbers<[1], [0], [0], [1], [0, 0, 1, 1], [], []>} : vector<64x32xbf16>, vector<32x32xbf16>, vector<64x32xf32> -> vector<64x32xf32>
    %18 = vector.broadcast %1 : vector<1x32xf32> to vector<64x32xf32>
    %19 = arith.addf %17, %18 : vector<64x32xf32>
    %cst_20 = arith.constant 0.000000e+00 : f32
    %20 = vector.broadcast %cst_20 : f32 to vector<64x32xf32>
    %21 = arith.maximumf %19, %20 : vector<64x32xf32>
    %22 = arith.truncf %21 : vector<64x32xf32> to vector<64x32xbf16>
    %cst_21 = arith.constant dense<0.000000e+00> : vector<64x32xf32>
    %23 = tpu.matmul %22, %4, %cst_21 {dimension_numbers = #tpu.dot_dimension_numbers<[1], [0], [0], [1], [0, 0, 1, 1], [], []>} : vector<64x32xbf16>, vector<32x32xbf16>, vector<64x32xf32> -> vector<64x32xf32>
    %24 = vector.broadcast %3 : vector<1x32xf32> to vector<64x32xf32>
    %25 = arith.addf %23, %24 : vector<64x32xf32>
    %26 = vector.shape_cast %21 : vector<64x32xf32> to vector<2x32x32xf32>
    %27 = vector.shape_cast %25 : vector<64x32xf32> to vector<2x32x32xf32>
    %c0_22 = arith.constant 0 : index
    %c0_23 = arith.constant 0 : index
    %28 = vector.load %arg4[%c0_22, %c0_23] : memref<2x32xf32, #tpu.memory_space<vmem>>, vector<2x32xf32>
    %c0_24 = arith.constant 0 : index
    %c0_25 = arith.constant 0 : index
    %29 = vector.load %arg3[%c0_24, %c0_25] : memref<2x32xf32, #tpu.memory_space<vmem>>, vector<2x32xf32>
    %30 = tpu.iota {dimensions = array<i32: 1>} : vector<2x8xi32>
    %31 = vector.extract_strided_slice %26 {offsets = [0, 0, 0], sizes = [2, 8, 32], strides = [1, 1, 1]} : vector<2x32x32xf32> to vector<2x8x32xf32>
    %32 = vector.extract_strided_slice %27 {offsets = [0, 0, 0], sizes = [2, 8, 32], strides = [1, 1, 1]} : vector<2x32x32xf32> to vector<2x8x32xf32>
    %33 = arith.truncf %28 : vector<2x32xf32> to vector<2x32xbf16>
    %cst_26 = arith.constant dense<0.000000e+00> : vector<2x32xf32>
    %34 = tpu.matmul %33, %5, %cst_26 {dimension_numbers = #tpu.dot_dimension_numbers<[1], [0], [0], [1], [0, 0, 1, 1], [], []>} : vector<2x32xbf16>, vector<32x32xbf16>, vector<2x32xf32> -> vector<2x32xf32>
    %35 = vector.shape_cast %34 : vector<2x32xf32> to vector<2x1x32xf32>
    %36 = vector.broadcast %35 : vector<2x1x32xf32> to vector<2x8x32xf32>
    %37 = arith.addf %32, %36 : vector<2x8x32xf32>
    %cst_27 = arith.constant 0.000000e+00 : f32
    %38 = vector.broadcast %cst_27 : f32 to vector<2x8x32xf32>
    %39 = arith.maximumf %37, %38 : vector<2x8x32xf32>
    %40 = arith.mulf %39, %11 : vector<2x8x32xf32>
    %cst_28 = arith.constant dense<0.000000e+00> : vector<2x8xf32>
    %41 = vector.multi_reduction <add>, %40, %cst_28 [2] : vector<2x8x32xf32> to vector<2x8xf32>
    %cst_29 = arith.constant dense<0xFF800000> : vector<2xf32>
    %42 = vector.multi_reduction <maximumf>, %41, %cst_29 [1] : vector<2x8xf32> to vector<2xf32>
    %43 = vector.shape_cast %42 : vector<2xf32> to vector<2x1xf32>
    %44 = vector.broadcast %43 : vector<2x1xf32> to vector<2x8xf32>
    %45 = arith.cmpf oeq, %41, %44 : vector<2x8xf32>
    %c8_i32 = arith.constant 8 : i32
    %46 = vector.broadcast %c8_i32 : i32 to vector<2x8xi32>
    %47 = arith.select %45, %30, %46 : vector<2x8xi1>, vector<2x8xi32>
    %cst_30 = arith.constant dense<2147483647> : vector<2xi32>
    %48 = vector.multi_reduction <minsi>, %47, %cst_30 [1] : vector<2x8xi32> to vector<2xi32>
    %49 = vector.shape_cast %48 : vector<2xi32> to vector<2x1xi32>
    %50 = vector.broadcast %49 : vector<2x1xi32> to vector<2x8xi32>
    %51 = arith.cmpi eq, %30, %50 : vector<2x8xi32>
    %52 = arith.extui %51 : vector<2x8xi1> to vector<2x8xi32>
    %53 = arith.sitofp %52 : vector<2x8xi32> to vector<2x8xf32>
    %54 = vector.shape_cast %53 : vector<2x8xf32> to vector<2x8x1xf32>
    %55 = vector.broadcast %54 : vector<2x8x1xf32> to vector<2x8x32xf32>
    %56 = arith.mulf %31, %55 : vector<2x8x32xf32>
    %cst_31 = arith.constant dense<0.000000e+00> : vector<2x32xf32>
    %57 = vector.multi_reduction <add>, %56, %cst_31 [1] : vector<2x8x32xf32> to vector<2x32xf32>
    %cst_32 = arith.constant dense<0.000000e+00> : vector<2x32xf32>
    %58 = vector.multi_reduction <add>, %31, %cst_32 [1] : vector<2x8x32xf32> to vector<2x32xf32>
    %59 = arith.subf %58, %57 : vector<2x32xf32>
    %60 = vector.extract_strided_slice %29 {offsets = [0, 0], sizes = [2, 8], strides = [1, 1]} : vector<2x32xf32> to vector<2x8xf32>
    %cst_33 = arith.constant 1.000000e+00 : f32
    %61 = vector.broadcast %cst_33 : f32 to vector<2x8xf32>
    %62 = arith.subf %61, %53 : vector<2x8xf32>
    %63 = arith.mulf %60, %62 : vector<2x8xf32>
    %cst_34 = arith.constant dense<0.000000e+00> : vector<2xf32>
    %64 = vector.multi_reduction <add>, %63, %cst_34 [1] : vector<2x8xf32> to vector<2xf32>
    %65 = vector.shape_cast %64 : vector<2xf32> to vector<2x1xf32>
    %cst_35 = arith.constant 0.000000e+00 : f32
    %66 = vector.broadcast %cst_35 : f32 to vector<2x1xf32>
    %67 = arith.cmpf ogt, %65, %66 : vector<2x1xf32>
    %cst_36 = arith.constant 1.000000e+00 : f32
    %68 = vector.broadcast %cst_36 : f32 to vector<2x1xf32>
    %69 = arith.select %67, %65, %68 : vector<2x1xi1>, vector<2x1xf32>
    %70 = vector.broadcast %69 : vector<2x1xf32> to vector<2x32xf32>
    %71 = arith.divf %59, %70 : vector<2x32xf32>
    %72 = tpu.concatenate %28, %57, %71 in 1 : vector<2x32xf32>, vector<2x32xf32>, vector<2x32xf32> -> vector<2x96xf32>
    %73 = arith.truncf %72 : vector<2x96xf32> to vector<2x96xbf16>
    %cst_37 = arith.constant dense<0.000000e+00> : vector<2x32xf32>
    %74 = tpu.matmul %73, %6, %cst_37 {dimension_numbers = #tpu.dot_dimension_numbers<[1], [0], [0], [1], [0, 0, 1, 1], [], []>} : vector<2x96xbf16>, vector<96x32xbf16>, vector<2x32xf32> -> vector<2x32xf32>
    %75 = vector.broadcast %7 : vector<1x32xf32> to vector<2x32xf32>
    %76 = arith.addf %74, %75 : vector<2x32xf32>
    %cst_38 = arith.constant 0.000000e+00 : f32
    %77 = vector.broadcast %cst_38 : f32 to vector<2x32xf32>
    %78 = arith.maximumf %76, %77 : vector<2x32xf32>
    %79 = vector.extract_strided_slice %26 {offsets = [0, 8, 0], sizes = [2, 8, 32], strides = [1, 1, 1]} : vector<2x32x32xf32> to vector<2x8x32xf32>
    %80 = vector.extract_strided_slice %27 {offsets = [0, 8, 0], sizes = [2, 8, 32], strides = [1, 1, 1]} : vector<2x32x32xf32> to vector<2x8x32xf32>
    %81 = arith.truncf %78 : vector<2x32xf32> to vector<2x32xbf16>
    %cst_39 = arith.constant dense<0.000000e+00> : vector<2x32xf32>
    %82 = tpu.matmul %81, %5, %cst_39 {dimension_numbers = #tpu.dot_dimension_numbers<[1], [0], [0], [1], [0, 0, 1, 1], [], []>} : vector<2x32xbf16>, vector<32x32xbf16>, vector<2x32xf32> -> vector<2x32xf32>
    %83 = vector.shape_cast %82 : vector<2x32xf32> to vector<2x1x32xf32>
    %84 = vector.broadcast %83 : vector<2x1x32xf32> to vector<2x8x32xf32>
    %85 = arith.addf %80, %84 : vector<2x8x32xf32>
    %cst_40 = arith.constant 0.000000e+00 : f32
    %86 = vector.broadcast %cst_40 : f32 to vector<2x8x32xf32>
    %87 = arith.maximumf %85, %86 : vector<2x8x32xf32>
    %88 = arith.mulf %87, %11 : vector<2x8x32xf32>
    %cst_41 = arith.constant dense<0.000000e+00> : vector<2x8xf32>
    %89 = vector.multi_reduction <add>, %88, %cst_41 [2] : vector<2x8x32xf32> to vector<2x8xf32>
    %cst_42 = arith.constant dense<0xFF800000> : vector<2xf32>
    %90 = vector.multi_reduction <maximumf>, %89, %cst_42 [1] : vector<2x8xf32> to vector<2xf32>
    %91 = vector.shape_cast %90 : vector<2xf32> to vector<2x1xf32>
    %92 = vector.broadcast %91 : vector<2x1xf32> to vector<2x8xf32>
    %93 = arith.cmpf oeq, %89, %92 : vector<2x8xf32>
    %c8_i32_43 = arith.constant 8 : i32
    %94 = vector.broadcast %c8_i32_43 : i32 to vector<2x8xi32>
    %95 = arith.select %93, %30, %94 : vector<2x8xi1>, vector<2x8xi32>
    %cst_44 = arith.constant dense<2147483647> : vector<2xi32>
    %96 = vector.multi_reduction <minsi>, %95, %cst_44 [1] : vector<2x8xi32> to vector<2xi32>
    %97 = vector.shape_cast %96 : vector<2xi32> to vector<2x1xi32>
    %98 = vector.broadcast %97 : vector<2x1xi32> to vector<2x8xi32>
    %99 = arith.cmpi eq, %30, %98 : vector<2x8xi32>
    %100 = arith.extui %99 : vector<2x8xi1> to vector<2x8xi32>
    %101 = arith.sitofp %100 : vector<2x8xi32> to vector<2x8xf32>
    %102 = vector.shape_cast %101 : vector<2x8xf32> to vector<2x8x1xf32>
    %103 = vector.broadcast %102 : vector<2x8x1xf32> to vector<2x8x32xf32>
    %104 = arith.mulf %79, %103 : vector<2x8x32xf32>
    %cst_45 = arith.constant dense<0.000000e+00> : vector<2x32xf32>
    %105 = vector.multi_reduction <add>, %104, %cst_45 [1] : vector<2x8x32xf32> to vector<2x32xf32>
    %cst_46 = arith.constant dense<0.000000e+00> : vector<2x32xf32>
    %106 = vector.multi_reduction <add>, %79, %cst_46 [1] : vector<2x8x32xf32> to vector<2x32xf32>
    %107 = arith.subf %106, %105 : vector<2x32xf32>
    %108 = vector.extract_strided_slice %29 {offsets = [0, 8], sizes = [2, 8], strides = [1, 1]} : vector<2x32xf32> to vector<2x8xf32>
    %cst_47 = arith.constant 1.000000e+00 : f32
    %109 = vector.broadcast %cst_47 : f32 to vector<2x8xf32>
    %110 = arith.subf %109, %101 : vector<2x8xf32>
    %111 = arith.mulf %108, %110 : vector<2x8xf32>
    %cst_48 = arith.constant dense<0.000000e+00> : vector<2xf32>
    %112 = vector.multi_reduction <add>, %111, %cst_48 [1] : vector<2x8xf32> to vector<2xf32>
    %113 = vector.shape_cast %112 : vector<2xf32> to vector<2x1xf32>
    %cst_49 = arith.constant 0.000000e+00 : f32
    %114 = vector.broadcast %cst_49 : f32 to vector<2x1xf32>
    %115 = arith.cmpf ogt, %113, %114 : vector<2x1xf32>
    %cst_50 = arith.constant 1.000000e+00 : f32
    %116 = vector.broadcast %cst_50 : f32 to vector<2x1xf32>
    %117 = arith.select %115, %113, %116 : vector<2x1xi1>, vector<2x1xf32>
    %118 = vector.broadcast %117 : vector<2x1xf32> to vector<2x32xf32>
    %119 = arith.divf %107, %118 : vector<2x32xf32>
    %120 = tpu.concatenate %78, %105, %119 in 1 : vector<2x32xf32>, vector<2x32xf32>, vector<2x32xf32> -> vector<2x96xf32>
    %121 = arith.truncf %120 : vector<2x96xf32> to vector<2x96xbf16>
    %cst_51 = arith.constant dense<0.000000e+00> : vector<2x32xf32>
    %122 = tpu.matmul %121, %6, %cst_51 {dimension_numbers = #tpu.dot_dimension_numbers<[1], [0], [0], [1], [0, 0, 1, 1], [], []>} : vector<2x96xbf16>, vector<96x32xbf16>, vector<2x32xf32> -> vector<2x32xf32>
    %123 = vector.broadcast %7 : vector<1x32xf32> to vector<2x32xf32>
    %124 = arith.addf %122, %123 : vector<2x32xf32>
    %cst_52 = arith.constant 0.000000e+00 : f32
    %125 = vector.broadcast %cst_52 : f32 to vector<2x32xf32>
    %126 = arith.maximumf %124, %125 : vector<2x32xf32>
    %127 = vector.extract_strided_slice %26 {offsets = [0, 16, 0], sizes = [2, 8, 32], strides = [1, 1, 1]} : vector<2x32x32xf32> to vector<2x8x32xf32>
    %128 = vector.extract_strided_slice %27 {offsets = [0, 16, 0], sizes = [2, 8, 32], strides = [1, 1, 1]} : vector<2x32x32xf32> to vector<2x8x32xf32>
    %129 = arith.truncf %126 : vector<2x32xf32> to vector<2x32xbf16>
    %cst_53 = arith.constant dense<0.000000e+00> : vector<2x32xf32>
    %130 = tpu.matmul %129, %5, %cst_53 {dimension_numbers = #tpu.dot_dimension_numbers<[1], [0], [0], [1], [0, 0, 1, 1], [], []>} : vector<2x32xbf16>, vector<32x32xbf16>, vector<2x32xf32> -> vector<2x32xf32>
    %131 = vector.shape_cast %130 : vector<2x32xf32> to vector<2x1x32xf32>
    %132 = vector.broadcast %131 : vector<2x1x32xf32> to vector<2x8x32xf32>
    %133 = arith.addf %128, %132 : vector<2x8x32xf32>
    %cst_54 = arith.constant 0.000000e+00 : f32
    %134 = vector.broadcast %cst_54 : f32 to vector<2x8x32xf32>
    %135 = arith.maximumf %133, %134 : vector<2x8x32xf32>
    %136 = arith.mulf %135, %11 : vector<2x8x32xf32>
    %cst_55 = arith.constant dense<0.000000e+00> : vector<2x8xf32>
    %137 = vector.multi_reduction <add>, %136, %cst_55 [2] : vector<2x8x32xf32> to vector<2x8xf32>
    %cst_56 = arith.constant dense<0xFF800000> : vector<2xf32>
    %138 = vector.multi_reduction <maximumf>, %137, %cst_56 [1] : vector<2x8xf32> to vector<2xf32>
    %139 = vector.shape_cast %138 : vector<2xf32> to vector<2x1xf32>
    %140 = vector.broadcast %139 : vector<2x1xf32> to vector<2x8xf32>
    %141 = arith.cmpf oeq, %137, %140 : vector<2x8xf32>
    %c8_i32_57 = arith.constant 8 : i32
    %142 = vector.broadcast %c8_i32_57 : i32 to vector<2x8xi32>
    %143 = arith.select %141, %30, %142 : vector<2x8xi1>, vector<2x8xi32>
    %cst_58 = arith.constant dense<2147483647> : vector<2xi32>
    %144 = vector.multi_reduction <minsi>, %143, %cst_58 [1] : vector<2x8xi32> to vector<2xi32>
    %145 = vector.shape_cast %144 : vector<2xi32> to vector<2x1xi32>
    %146 = vector.broadcast %145 : vector<2x1xi32> to vector<2x8xi32>
    %147 = arith.cmpi eq, %30, %146 : vector<2x8xi32>
    %148 = arith.extui %147 : vector<2x8xi1> to vector<2x8xi32>
    %149 = arith.sitofp %148 : vector<2x8xi32> to vector<2x8xf32>
    %150 = vector.shape_cast %149 : vector<2x8xf32> to vector<2x8x1xf32>
    %151 = vector.broadcast %150 : vector<2x8x1xf32> to vector<2x8x32xf32>
    %152 = arith.mulf %127, %151 : vector<2x8x32xf32>
    %cst_59 = arith.constant dense<0.000000e+00> : vector<2x32xf32>
    %153 = vector.multi_reduction <add>, %152, %cst_59 [1] : vector<2x8x32xf32> to vector<2x32xf32>
    %cst_60 = arith.constant dense<0.000000e+00> : vector<2x32xf32>
    %154 = vector.multi_reduction <add>, %127, %cst_60 [1] : vector<2x8x32xf32> to vector<2x32xf32>
    %155 = arith.subf %154, %153 : vector<2x32xf32>
    %156 = vector.extract_strided_slice %29 {offsets = [0, 16], sizes = [2, 8], strides = [1, 1]} : vector<2x32xf32> to vector<2x8xf32>
    %cst_61 = arith.constant 1.000000e+00 : f32
    %157 = vector.broadcast %cst_61 : f32 to vector<2x8xf32>
    %158 = arith.subf %157, %149 : vector<2x8xf32>
    %159 = arith.mulf %156, %158 : vector<2x8xf32>
    %cst_62 = arith.constant dense<0.000000e+00> : vector<2xf32>
    %160 = vector.multi_reduction <add>, %159, %cst_62 [1] : vector<2x8xf32> to vector<2xf32>
    %161 = vector.shape_cast %160 : vector<2xf32> to vector<2x1xf32>
    %cst_63 = arith.constant 0.000000e+00 : f32
    %162 = vector.broadcast %cst_63 : f32 to vector<2x1xf32>
    %163 = arith.cmpf ogt, %161, %162 : vector<2x1xf32>
    %cst_64 = arith.constant 1.000000e+00 : f32
    %164 = vector.broadcast %cst_64 : f32 to vector<2x1xf32>
    %165 = arith.select %163, %161, %164 : vector<2x1xi1>, vector<2x1xf32>
    %166 = vector.broadcast %165 : vector<2x1xf32> to vector<2x32xf32>
    %167 = arith.divf %155, %166 : vector<2x32xf32>
    %168 = tpu.concatenate %126, %153, %167 in 1 : vector<2x32xf32>, vector<2x32xf32>, vector<2x32xf32> -> vector<2x96xf32>
    %169 = arith.truncf %168 : vector<2x96xf32> to vector<2x96xbf16>
    %cst_65 = arith.constant dense<0.000000e+00> : vector<2x32xf32>
    %170 = tpu.matmul %169, %6, %cst_65 {dimension_numbers = #tpu.dot_dimension_numbers<[1], [0], [0], [1], [0, 0, 1, 1], [], []>} : vector<2x96xbf16>, vector<96x32xbf16>, vector<2x32xf32> -> vector<2x32xf32>
    %171 = vector.broadcast %7 : vector<1x32xf32> to vector<2x32xf32>
    %172 = arith.addf %170, %171 : vector<2x32xf32>
    %cst_66 = arith.constant 0.000000e+00 : f32
    %173 = vector.broadcast %cst_66 : f32 to vector<2x32xf32>
    %174 = arith.maximumf %172, %173 : vector<2x32xf32>
    %175 = vector.extract_strided_slice %27 {offsets = [0, 24, 0], sizes = [2, 8, 32], strides = [1, 1, 1]} : vector<2x32x32xf32> to vector<2x8x32xf32>
    %176 = arith.truncf %174 : vector<2x32xf32> to vector<2x32xbf16>
    %cst_67 = arith.constant dense<0.000000e+00> : vector<2x32xf32>
    %177 = tpu.matmul %176, %5, %cst_67 {dimension_numbers = #tpu.dot_dimension_numbers<[1], [0], [0], [1], [0, 0, 1, 1], [], []>} : vector<2x32xbf16>, vector<32x32xbf16>, vector<2x32xf32> -> vector<2x32xf32>
    %178 = vector.shape_cast %177 : vector<2x32xf32> to vector<2x1x32xf32>
    %179 = vector.broadcast %178 : vector<2x1x32xf32> to vector<2x8x32xf32>
    %180 = arith.addf %175, %179 : vector<2x8x32xf32>
    %cst_68 = arith.constant 0.000000e+00 : f32
    %181 = vector.broadcast %cst_68 : f32 to vector<2x8x32xf32>
    %182 = arith.maximumf %180, %181 : vector<2x8x32xf32>
    %183 = arith.mulf %182, %11 : vector<2x8x32xf32>
    %cst_69 = arith.constant dense<0.000000e+00> : vector<2x8xf32>
    %184 = vector.multi_reduction <add>, %183, %cst_69 [2] : vector<2x8x32xf32> to vector<2x8xf32>
    %185 = tpu.concatenate %41, %89, %137, %184 in 1 : vector<2x8xf32>, vector<2x8xf32>, vector<2x8xf32>, vector<2x8xf32> -> vector<2x32xf32>
    %c0_70 = arith.constant 0 : index
    %c0_71 = arith.constant 0 : index
    %186 = vector.load %arg12[%c0_70, %c0_71] : memref<2x32xf32, #tpu.memory_space<vmem>>, vector<2x32xf32>
    tpu.vector_store %arg12[%c0_70, %c0_71], %185 {strides = array<i32>} : memref<2x32xf32, #tpu.memory_space<vmem>>, vector<2x32xf32>,
    return
  }
  func.func @transform_0(%arg0: i32) -> (i32, i32, i32) {
    %c0_i32 = arith.constant 0 : i32
    %c0_i32_0 = arith.constant 0 : i32
    %c0_i32_1 = arith.constant 0 : i32
    return %arg0, %c0_i32, %c0_i32_0 : i32, i32, i32
  }
  func.func @transform_1(%arg0: i32) -> (i32, i32, i32) {
    %c0_i32 = arith.constant 0 : i32
    %c0_i32_0 = arith.constant 0 : i32
    %c0_i32_1 = arith.constant 0 : i32
    return %arg0, %c0_i32, %c0_i32_0 : i32, i32, i32
  }
  func.func @transform_2(%arg0: i32) -> (i32, i32) {
    %c0_i32 = arith.constant 0 : i32
    %c0_i32_0 = arith.constant 0 : i32
    return %arg0, %c0_i32 : i32, i32
  }
  func.func @transform_3(%arg0: i32) -> (i32, i32) {
    %c0_i32 = arith.constant 0 : i32
    %c0_i32_0 = arith.constant 0 : i32
    return %arg0, %c0_i32 : i32, i32
  }
  func.func @transform_4(%arg0: i32) -> (i32, i32) {
    %c0_i32 = arith.constant 0 : i32
    %c0_i32_0 = arith.constant 0 : i32
    %c0_i32_1 = arith.constant 0 : i32
    return %c0_i32, %c0_i32_0 : i32, i32
  }
  func.func @transform_5(%arg0: i32) -> (i32, i32) {
    %c0_i32 = arith.constant 0 : i32
    %c0_i32_0 = arith.constant 0 : i32
    %c0_i32_1 = arith.constant 0 : i32
    return %c0_i32, %c0_i32_0 : i32, i32
  }
  func.func @transform_6(%arg0: i32) -> (i32, i32) {
    %c0_i32 = arith.constant 0 : i32
    %c0_i32_0 = arith.constant 0 : i32
    %c0_i32_1 = arith.constant 0 : i32
    return %c0_i32, %c0_i32_0 : i32, i32
  }
  func.func @transform_7(%arg0: i32) -> (i32, i32) {
    %c0_i32 = arith.constant 0 : i32
    %c0_i32_0 = arith.constant 0 : i32
    %c0_i32_1 = arith.constant 0 : i32
    return %c0_i32, %c0_i32_0 : i32, i32
  }
  func.func @transform_8(%arg0: i32) -> (i32, i32) {
    %c0_i32 = arith.constant 0 : i32
    %c0_i32_0 = arith.constant 0 : i32
    %c0_i32_1 = arith.constant 0 : i32
    return %c0_i32, %c0_i32_0 : i32, i32
  }
  func.func @transform_9(%arg0: i32) -> (i32, i32) {
    %c0_i32 = arith.constant 0 : i32
    %c0_i32_0 = arith.constant 0 : i32
    %c0_i32_1 = arith.constant 0 : i32
    return %c0_i32, %c0_i32_0 : i32, i32
  }
  func.func @transform_10(%arg0: i32) -> (i32, i32) {
    %c0_i32 = arith.constant 0 : i32
    %c0_i32_0 = arith.constant 0 : i32
    %c0_i32_1 = arith.constant 0 : i32
    return %c0_i32, %c0_i32_0 : i32, i32
  }
  func.func @transform_11(%arg0: i32) -> (i32, i32) {
    %c0_i32 = arith.constant 0 : i32
    %c0_i32_0 = arith.constant 0 : i32
    return %arg0, %c0_i32 : i32, i32
  }
}

</mosaic_0001>

<bundles_post_ra>
// kernel: tpu_custom_call.1
= control target key start
LH: loop header
LB: loop body
LE: loop exit
PB: predicated region body
PF: predicated region fallthrough
CT: control target
= control target key end

     0   :  { %vm99_vm0 = vcmask 130048   ;;  %s1665_s0 = inlined_call_operand.vmem [shape: bf16[2,32,16], index: 0, kind: input, shape index: {}]   ;;  %s1666_s1 = inlined_call_operand.vmem [shape: bf16[2,16,32], index: 1, kind: input, shape index: {}]   ;;  %s1667_s2 = inlined_call_operand.vmem [shape: f32[2,32], index: 2, kind: input, shape index: {}]   ;;  %s1668_s3 = inlined_call_operand.vmem [shape: f32[2,32], index: 3, kind: input, shape index: {}]   ;;  %s1669_s4 = inlined_call_operand.vmem [shape: bf16[32,32], index: 4, kind: input, shape index: {}]   ;;  %s1670_s5 = inlined_call_operand.vmem [shape: f32[1,32], index: 5, kind: input, shape index: {}]   ;;  %s1671_s6 = inlined_call_operand.vmem [shape: bf16[64,32], index: 6, kind: input, shape index: {}]   ;;  %s1672_s7 = inlined_call_operand.vmem [shape: f32[1,32], index: 7, kind: input, shape index: {}]   ;;  %s1673_s8 = inlined_call_operand.vmem [shape: f32[1,32], index: 8, kind: input, shape index: {}]   ;;  %s1674_s9 = inlined_call_operand.vmem [shape: bf16[96,32], index: 9, kind: input, shape index: {}]   ;;  %s1675_s10 = inlined_call_operand.vmem [shape: f32[1,32], index: 10, kind: input, shape index: {}]   ;;  %s1676_s11 = inlined_call_operand.hbm [shape: f32[2,32], index: 11, kind: output, shape index: {}]  }
   0x1   :  { %v1161_v0 = vld [vmem:[%s1666_s1] sm:$0xff]  ;;  %v1162_v2 = vld [vmem:[%s1666_s1 + $0x8] sm:$0xff]  ;;  %v1159_v3 = vld [vmem:[%s1665_s0 + $0x10] sm:$0xff] }
   0x2   :  { %v1157_v1 = vld [vmem:[%s1665_s0] sm:$0xff]  ;;  %113 = vmatpush.bf16.msra.mxu0 %v1161_v0  ;;  %154 = vmatpush.bf16.msra.mxu1 %v1162_v2 }
   0x3   :  { %16 = vsyncpa [#allocation3], 0  ;;  %v1158_v4 = vld [vmem:[%s1665_s0 + $0x8] sm:$0xff]  ;;  %v1145_v6 = vld [vmem:[%s1669_s4] sm:$0xff]  ;;  %vm185_vm1 = vcmask 261120   ;;  %v297_v2 = vlaneseq  ;;  %vm350_vm2 = vcmask 1041409  }
   0x4   :  { %v1146_v5 = vld [vmem:[%s1669_s4 + $0x8] sm:$0xff]  ;;  %v1147_v17 = vld [vmem:[%s1671_s6] sm:$0xff]  ;;  %v1150_v18 = vld [vmem:[%s1671_s6 + $0x18] sm:$0xff]  ;;  %vm353_vm3 = vcmask 58368   ;;  %s1238_s4 = smov 32   ;;  %s1239_s13 = smov 64  }
   0x5   :  { %1063 = vmatmul.msk.bf16.vlgmr.msra.gmra.mxu0 %vm99_vm0, %v1157_v1  ;;  %1077 = vmatmul.msk.bf16.vlgmr.msra.gmra.mxu1 %vm99_vm0, %v1159_v3  ;;  %v1148_v16 = vld [vmem:[%s1671_s6 + $0x8] sm:$0xff]  ;;  %v1149_v19 = vld [vmem:[%s1671_s6 + $0x10] sm:$0xff]  ;;  %v1347_v20 = vld [vmem:[%s1668_s3] sm:$0x3]  ;;  %v1403_v3 = vshrl.u32 %v297_v2, 7  ;;  %s1241_s19 = smov 120  }
   0x6   :  { %204 = vmatpush.bf16.msra.mxu2 %v1146_v5  ;;  %272 = vmatpush.bf16.msra.mxu3 %v1148_v16  ;;  %v299_v21 = vpack.c.bf16 %v1347_v20, %v1347_v20  ;;  %v1355_v23 = vld [vmem:[%s1670_s5] ss:$0 sm:$0xff]  ;;  %v1407_v5 = vand.u32 127, %v297_v2  ;;  %s1242_s20 = smov 16   ;;  %s1243_s21 = smov 112  }
   0x7   :  { %321 = vmatpush.bf16.msrb.mxu0 %v1150_v18  ;;  %v1384_v46 = vld [vmem:[%s1672_s7] ss:$0 sm:$0xff]  ;;  %1172 = vset.pattern.permute.xlu1 %v1403_v3 }
   0x8   :  { %v1390_v51 = vld [vmem:[%s1673_s8] ss:$0 sm:$0xff]  ;;  %1174 = vset.pattern.permute.xlu0 %v1403_v3 }
   0x9   :  { %v1461_v2 = vld [vmem:[%s1674_s9 + $0x20] sm:$0xff] }
   0xa   :  { %205 = vmatpush.bf16.msra.mxu2 %v1145_v6  ;;  %273 = vmatpush.bf16.msra.mxu3 %v1147_v17 }
   0xb   :  { %322 = vmatpush.bf16.msrb.mxu0 %v1149_v19 }
   0xe   :  { %986 = vmatpush.bf16.msrb.mxu3 %v1150_v18 }
   0xf   :  { %570 = vmatpush.bf16.msra.mxu0 %v1150_v18 }
  0x12   :  { %987 = vmatpush.bf16.msrb.mxu3 %v1149_v19 }
  0x13   :  { %571 = vmatpush.bf16.msra.mxu0 %v1149_v19 }
  0x15   :  { %1064 = vmatmul.msk.bf16.gmra.mxu0 %vm99_vm0, %v1158_v4 }
  0x25   :  { %1111 = vmatmul.msk.bf16.vlgmr.msrb.gmra.mxu0 %vm185_vm1, %v299_v21 }
  0x26   :  { %778 = vmatpush.bf16.msrb.mxu0 %v1150_v18 }
  0x2a   :  { %779 = vmatpush.bf16.msrb.mxu0 %v1149_v19 }
  0x82   :  { %v115_v7 = vpop.f32.mrf.mxu0  ;;  %v156_v13 = vpop.f32.mrf.mxu1 }
  0x8a   :  { %v117_v8 = vpop.f32.mrf.mxu0  ;;  %v158_v14 = vpop.f32.mrf.mxu1 }
  0x8b   :  { %v166_v9 = vpack.c.bf16 %v117_v8, %v115_v7  ;;  %v168_v15 = vpack.c.bf16 %v158_v14, %v156_v13 }
  0x8d   :  { %1087 = vmatmul.msk.bf16.vlgmr.msra.gmra.mxu2 %vm185_vm1, %v166_v9 }
  0x92   :  { %v120_v10 = vpop.f32.mrf.mxu0 }
  0x9a   :  { %v122_v11 = vpop.f32.mrf.mxu0 }
  0x9b   :  { %v167_v12 = vpack.c.bf16 %v122_v11, %v120_v10  ;;  %v1236_v11 = vmov 0  }
  0x9c   :  { %1173 = vset.pattern.permute.xlu2 %v1236_v11 }
  0x9d   :  { %1088 = vmatmul.msk.bf16.gmra.mxu2 %vm185_vm1, %v167_v12 }
  0xa2   :  { %v324_v44 = vpop.f32.mrf.mxu0 }
  0xa3   :  { %v330_v47 = vperm.slane %v324_v44, 0  ;;  %v329_v58 = vrot.slane %v324_v44, 1  ;;  %v1430_v44 = vld [vmem:[%s1667_s2] sm:$0x3]  ;;  %s1042_s2 = sshll.u32 %s1676_s11, 4  ;;  %s1043_s2 = int_to_ptr.hbm [resolvable:$true] %s1042_s2 }
  0xa5   :  { %v331_v60 = vperm.slane %v329_v58, 0 }
  0xaa   :  { %v326_v45 = vpop.f32.mrf.mxu0 }
  0xad   :  { %1089 = vmatmul.msk.bf16.gmra.mxu2 %vm185_vm1, %v168_v15 }
 0x110   :  { %v207_v22 = vpop.f32.mrf.mxu2 }
 0x111   :  { %v208_v24 = vadd.f32 %v1355_v23, %v207_v22 }
 0x113   :  { %v1359_v27 = vmax.f32 %v208_v24, 0.0 }
 0x118   :  { %v209_v25 = vpop.f32.mrf.mxu2 }
 0x119   :  { %v210_v26 = vadd.f32 %v1355_v23, %v209_v25 }
 0x11b   :  { %v1361_v28 = vmax.f32 %v210_v26, 0.0 }
 0x11d   :  { %v235_v29 = vpack.c.bf16 %v1361_v28, %v1359_v27 }
 0x11f   :  { %1099 = vmatmul.msk.bf16.vlgmr.msra.gmra.mxu3 %vm185_vm1, %v235_v29 }
 0x120   :  { %v212_v30 = vpop.f32.mrf.mxu2 }
 0x121   :  { %v213_v31 = vadd.f32 %v1355_v23, %v212_v30 }
 0x123   :  { %v1368_v34 = vmax.f32 %v213_v31, 0.0 }
 0x128   :  { %v214_v32 = vpop.f32.mrf.mxu2 }
 0x129   :  { %v215_v33 = vadd.f32 %v1355_v23, %v214_v32 }
 0x12b   :  { %v230_v35 = vmax.f32 %v215_v33, 0.0 }
 0x12d   :  { %v236_v36 = vpack.c.bf16 %v230_v35, %v1368_v34 }
 0x12f   :  { %1100 = vmatmul.msk.bf16.gmra.mxu3 %vm185_vm1, %v236_v36 }
 0x130   :  { %v217_v37 = vpop.f32.mrf.mxu2 }
 0x131   :  { %v218_v38 = vadd.f32 %v1355_v23, %v217_v37 }
 0x133   :  { %v1374_v41 = vmax.f32 %v218_v38, 0.0 }
 0x138   :  { %v219_v39 = vpop.f32.mrf.mxu2 }
 0x139   :  { %v220_v40 = vadd.f32 %v1355_v23, %v219_v39 }
 0x13b   :  { %v1376_v42 = vmax.f32 %v220_v40, 0.0  ;;  %v1237_v40 = vmov 0.0  }
 0x13d   :  { %v237_v43 = vpack.c.bf16 %v1376_v42, %v1374_v41 }
 0x13f   :  { %1101 = vmatmul.msk.bf16.gmra.mxu3 %vm185_vm1, %v237_v43 }
 0x1a2   :  { %v275_v48 = vpop.f32.mrf.mxu3 }
 0x1a3   :  { %v276_v49 = vadd.f32 %v1384_v46, %v275_v48 }
 0x1a5   :  { %v334_v50 = vadd.f32 %v330_v47, %v276_v49 }
 0x1a7   :  { %v336_v52 = vmax.f32 %v334_v50, 0.0 }
 0x1a9   :  { %v338_v53 = vmul.f32 %v1390_v51, %v336_v52 }
 0x1aa   :  { %v1393_v54 = vpop.f32.mrf.mxu3 }
 0x1ab   :  { %v340_v55 = vsel %vm185_vm1, %v338_v53, 0.0 }
 0x1ac   :  { %341 = vadd.xlane.f32.xlu0 %v340_v55 }
 0x1b2   :  { %v1396_v56 = vpop.f32.mrf.mxu3 }
 0x1ba   :  { %v1398_v57 = vpop.f32.mrf.mxu3 }
 0x1c2   :  { %v285_v59 = vpop.f32.mrf.mxu3 }
 0x1c3   :  { %v286_v61 = vadd.f32 %v1384_v46, %v285_v59  ;;  %v436_v59 = vsel %vm185_vm1, %v1374_v41, 0.0 }
 0x1c5   :  { %v335_v62 = vadd.f32 %v331_v60, %v286_v61  ;;  %v429_v60 = vsel %vm185_vm1, %v1359_v27, 0.0  ;;  %v437_v61 = vrot.slane %v436_v59, 4 }
 0x1c7   :  { %v337_v63 = vmax.f32 %v335_v62, 0.0  ;;  %v1160_v62 = vld [vmem:[%s1665_s0 + $0x18] sm:$0xff] }
 0x1c8   :  { %1078 = vmatmul.msk.bf16.gmra.mxu1 %vm99_vm0, %v1160_v62 }
 0x1c9   :  { %v339_v0 = vmul.f32 %v1390_v51, %v337_v63  ;;  %v1451_v63 = vld [vmem:[%s1674_s9 + $0x28] sm:$0xff] }
 0x1ca   :  { %964 = vmatpush.bf16.msrb.mxu2 %v1451_v63  ;;  %548 = vmatpush.bf16.msrb.mxu1 %v1451_v63 }
 0x1cb   :  { %v343_v1 = vsel %vm185_vm1, %v339_v0, 0.0 }
 0x1cc   :  { %344 = vadd.xlane.f32.xlu0 %v343_v1  ;;  %v430_v1 = vrot.slane %v429_v60, 4 }
 0x1ce   :  { %965 = vmatpush.bf16.msrb.mxu2 %v1461_v2  ;;  %549 = vmatpush.bf16.msrb.mxu1 %v1461_v2 }
 0x21f   :  { %v342_v4 = vpop.xlane.xlu0 %341 }
 0x220   :  { %v348_v7 = vperm.slane %v342_v4, %v1407_v5 }
 0x23f   :  { %v345_v6 = vpop.xlane.xlu0 %344 }
 0x240   :  { %v349_v8 = vperm.slane %v345_v6, %v1407_v5 }
 0x242   :  { %v1412_v9 = vsel %vm350_vm2, %v349_v8, %v348_v7 }
 0x243   :  { %v354_v10 = vsel %vm353_vm3, %v1412_v9, -inf }
 0x244   :  { %355 = vmax.xlane.f32.xlu1 %v354_v10  ;;  %v431_v10 = vadd.f32 %v430_v1, %v429_v60 }
 0x25d   :  { %368 = vperm.xlu1 %1172, %v1407_v5  }
 0x2b7   :  { %v356_v12 = vpop.xlane.xlu1 %355 }
 0x2b8   :  { %v358_v13 = vperm.slane %v356_v12, 0  ;;  %v359_v16 = vperm.slane %v356_v12, 1 }
 0x2ba   :  { %vm362_vm4 = vcmp.eq.f32.partialorder %v342_v4, %v358_v13  ;;  %vm363_vm5 = vcmp.eq.f32.partialorder %v345_v6, %v359_v16  ;;  %v438_v4 = vadd.f32 %v437_v61, %v436_v59  ;;  %v1472_v13 = vld [vmem:[%s1674_s9 + $0x18] sm:$0xff] }
 0x2bb   :  { %966 = vmatpush.bf16.msrb.mxu2 %v1472_v13  ;;  %550 = vmatpush.bf16.msrb.mxu1 %v1472_v13 }
 0x2cf   :  { %v1417_v14 = vpop.permute.xlu1 %368 }
 0x2d0   :  { %v370_v15 = vsel %vm362_vm4, %v1417_v14, 8  ;;  %v371_v17 = vsel %vm363_vm5, %v1417_v14, 8  ;;  %vm500_vm5 = vcmask 523264  }
 0x2d1   :  { %373 = vperm.xlu2 %1173, %v370_v15   ;;  %v439_v15 = vrot.slane %v438_v4, 2 }
 0x2d9   :  { %376 = vperm.xlu2 %1173, %v371_v17  }
 0x32b   :  { %v374_v18 = vpop.permute.xlu2 %373 }
 0x32c   :  { %v378_v21 = vperm.slane %v374_v18, %v1407_v5 }
 0x333   :  { %v377_v19 = vpop.permute.xlu2 %376 }
 0x334   :  { %v379_v22 = vperm.slane %v377_v19, %v1407_v5 }
 0x336   :  { %v380_v24 = vsel %vm350_vm2, %v379_v22, %v378_v21  ;;  %v432_v21 = vrot.slane %v431_v10, 2 }
 0x337   :  { %v381_v25 = vsel %vm353_vm3, %v380_v24, 2147483647 }
 0x338   :  { %v383_v26 = vshra.s32 %v381_v25, 16  ;;  %v382_v30 = vand.u32 65535, %v381_v25 }
 0x33a   :  { %v385_v29 = vcvt.s32.f32 %v383_v26  ;;  %v384_v32 = vcvt.s32.f32 %v382_v30 }
 0x33c   :  { %386 = vmin.xlane.f32.xlu0 %v385_v29 }
 0x3af   :  { %v387_v31 = vpop.xlane.xlu0 %386 }
 0x3b0   :  { %vm388_vm6 = vcmp.eq.f32.partialorder %v385_v29, %v387_v31  ;;  %v393_v35 = vcvt.f32.s32 %v387_v31 }
 0x3b1   :  { %v389_v33 = vsel %vm388_vm6, %v384_v32, inf  ;;  %vm542_vm6 = vcmask 785408  }
 0x3b2   :  { %390 = vmin.xlane.f32.xlu2 %v389_v33  ;;  %v394_v37 = vshll.u32 %v393_v35, 16  ;;  %v433_v33 = vadd.f32 %v432_v21, %v431_v10 }
 0x425   :  { %v391_v36 = vpop.xlane.xlu2 %390 }
 0x426   :  { %v392_v38 = vcvt.f32.s32 %v391_v36 }
 0x428   :  { %v395_v39 = vadd.s32 %v394_v37, %v392_v38 }
 0x42a   :  { %vm396_vm7 = vcmp.eq.s32.totalorder %v1407_v5, %v395_v39 }
 0x42b   :  { %v1112_v43 = vsel %vm396_vm7, 1.0, %v1237_v40 }
 0x42c   :  { %v445_v45 = vsub.f32 1.0, %v1112_v43  ;;  %v399_v49 = vperm.slane %v1112_v43, 0  ;;  %v406_v50 = vperm.slane %v1112_v43, 1 }
 0x42e   :  { %v446_v47 = vmul.f32 %v445_v45, %v1430_v44  ;;  %v1175_v52 = vpack.i.bf16 %v399_v49, %v406_v50 }
 0x430   :  { %v447_v48 = vsel %vm353_vm3, %v446_v47, 0.0  ;;  %v434_v47 = vrot.slane %v433_v33, 1 }
 0x431   :  { %448 = vadd.xlane.f32.xlu0 %v447_v48 }
 0x445   :  { %1176 = vperm.xlu0 %1174, %v1175_v52  }
 0x44d   :  { %1180 = vset.pattern.permute.xlu0 %v1236_v11 }
 0x4a4   :  { %v449_v53 = vpop.xlane.xlu0 %448 }
 0x4a5   :  { %vm450_vm8 = vcmp.gt.f32.partialorder %v449_v53, 0.0 }
 0x4a6   :  { %v1434_v55 = vsel %vm450_vm8, %v449_v53, 1.0 }
 0x4a7   :  { %v1437_v58 = vrot.slane %v1434_v55, 1  ;;  %vm461_vm13 = vweird.f32 %v1434_v55 }
 0x4a9   :  { %1196 = vrcp.f32 %v1437_v58  ;;  %v482_v48 = vand.u32 2147483648, %v1437_v58  ;;  %vm476_vm10 = vweird.f32 %v1437_v58  ;;  %v480_v52 = vand.u32 2147483647, %v1437_v58 }
 0x4aa   :  { %1198 = vrcp.f32 %v1434_v55 }
 0x4ab   :  { %vm481_vm14 = vcmp.eq.f32.partialorder %v480_v52, 8.507059e+37 }
 0x4af   :  { %v1453_v0 = vpop.eup %1196 }
 0x4b0   :  { %v472_v7 = vmul.f32 %v1453_v0, %v1437_v58  ;;  %v1465_v8 = vpop.eup %1198  ;;  %vm477_vm9 = vweird.f32 %v1453_v0  ;;  %v435_v58 = vadd.f32 %v434_v47, %v433_v33  ;;  %v287_v47 = vpop.f32.mrf.mxu3 }
 0x4b1   :  { %v457_v18 = vmul.f32 %v1465_v8, %v1434_v55  ;;  %vm462_vm11 = vweird.f32 %v1465_v8  ;;  %vm1493_vm12 = vmor %vm476_vm10, %vm477_vm9 }
 0x4b2   :  { %v473_v19 = vsub.f32 1.0, %v472_v7  ;;  %vm463_vm15 = vmor %vm461_vm13, %vm462_vm11 }
 0x4b3   :  { %v458_v29 = vsub.f32 1.0, %v457_v18 }
 0x4b4   :  { %v474_v32 = vmul.f32 %v1453_v0, %v473_v19 }
 0x4b5   :  { %v459_v38 = vmul.f32 %v1465_v8, %v458_v29 }
 0x4b6   :  { %v475_v45 = vadd.f32 %v1453_v0, %v474_v32 }
 0x4b7   :  { %v1177_v6 = vpop.permute.xlu0 %1176  ;;  %v460_v62 = vadd.f32 %v1465_v8, %v459_v38 }
 0x4b8   :  { %v1179_v11 = vunpack.i.h.bf16 %v1177_v6  ;;  %v1178_v12 = vunpack.i.l.bf16 %v1177_v6  ;;  %v479_v1 = vsel %vm1493_vm12, %v1453_v0, %v475_v45  ;;  %v483_v6 = vor.u32 1.1754944e-38, %v482_v48 }
 0x4ba   :  { %v413_v16 = vmul.f32 %v1179_v11, %v1359_v27  ;;  %v414_v17 = vmul.f32 %v1178_v12, %v1374_v41  ;;  %v1153_v27 = vld [vmem:[%s1674_s9 + $0x10] sm:$0xff]  ;;  %v440_v41 = vadd.f32 %v439_v15, %v438_v4  ;;  %v467_v4 = vand.u32 2147483648, %v1434_v55 }
 0x4bb   :  { %967 = vmatpush.bf16.msrb.mxu2 %v1153_v27  ;;  %551 = vmatpush.bf16.msrb.mxu1 %v1153_v27  ;;  %v465_v11 = vand.u32 2147483647, %v1434_v55  ;;  %v484_v12 = vsel %vm481_vm14, %v483_v6, %v479_v1  ;;  %v464_v15 = vsel %vm463_vm15, %v1465_v8, %v460_v62  ;;  %v1152_v55 = vld [vmem:[%s1674_s9 + $0x8] sm:$0xff]  ;;  %v1151_v8 = vld [vmem:[%s1674_s9] sm:$0xff] }
 0x4bc   :  { %v415_v22 = vsel %vm185_vm1, %v413_v16, 0.0  ;;  %v422_v24 = vsel %vm185_vm1, %v414_v17, 0.0  ;;  %v441_v37 = vrot.slane %v440_v41, 1  ;;  %v468_v17 = vor.u32 1.1754944e-38, %v467_v4 }
 0x4bd   :  { %v416_v25 = vrot.slane %v415_v22, 4  ;;  %v423_v26 = vrot.slane %v422_v24, 4  ;;  %vm466_vm4 = vcmp.eq.f32.partialorder %v465_v11, 8.507059e+37 }
 0x4be   :  { %v442_v53 = vadd.f32 %v441_v37, %v440_v41  ;;  %v469_v19 = vsel %vm466_vm4, %v468_v17, %v464_v15 }
 0x4bf   :  { %v417_v30 = vadd.f32 %v416_v25, %v415_v22  ;;  %v424_v31 = vadd.f32 %v423_v26, %v422_v24  ;;  %552 = vmatpush.bf16.msrb.mxu1 %v1152_v55  ;;  %968 = vmatpush.bf16.msrb.mxu2 %v1152_v55  ;;  %v161_v24 = vpop.f32.mrf.mxu1 }
 0x4c1   :  { %v418_v35 = vrot.slane %v417_v30, 2  ;;  %v425_v36 = vrot.slane %v424_v31, 2 }
 0x4c3   :  { %v419_v39 = vadd.f32 %v418_v35, %v417_v30  ;;  %v426_v43 = vadd.f32 %v425_v36, %v424_v31  ;;  %553 = vmatpush.bf16.msrb.mxu1 %v1151_v8  ;;  %969 = vmatpush.bf16.msrb.mxu2 %v1151_v8 }
 0x4c5   :  { %v420_v49 = vrot.slane %v419_v39, 1  ;;  %v427_v50 = vrot.slane %v426_v43, 1 }
 0x4c7   :  { %v421_v60 = vadd.f32 %v420_v49, %v419_v39  ;;  %v428_v61 = vadd.f32 %v427_v50, %v426_v43  ;;  %756 = vmatpush.bf16.msra.mxu1 %v1451_v63  ;;  %v163_v25 = vpop.f32.mrf.mxu1  ;;  %v278_v49 = vadd.f32 %v1384_v46, %v1393_v54 }
 0x4c8   :  { %v169_v26 = vpack.c.bf16 %v163_v25, %v161_v24 }
 0x4c9   :  { %v488_v7 = vsel %vm350_vm2, %v428_v61, %v421_v60  ;;  %v444_v10 = vsub.f32 %v442_v53, %v428_v61  ;;  %v443_v0 = vsub.f32 %v435_v58, %v421_v60 }
 0x4ca   :  { %489 = vrot.lane.b32.xlu1 %v488_v7, %s1238_s4  ;;  %1090 = vmatmul.msk.bf16.gmra.mxu2 %vm185_vm1, %v169_v26 }
 0x4cb   :  { %v485_v16 = vmul.f32 %v484_v12, %v444_v10  ;;  %v470_v21 = vmul.f32 %v469_v19, %v443_v0  ;;  %757 = vmatpush.bf16.msra.mxu1 %v1461_v2 }
 0x4cd   :  { %v494_v18 = vrot.slane %v485_v16, 7 }
 0x4cf   :  { %v495_v22 = vsel %vm350_vm2, %v494_v18, %v470_v21  ;;  %758 = vmatpush.bf16.msra.mxu1 %v1472_v13 }
 0x4d2   :  { %496 = vrot.lane.b32.xlu1 %v495_v22, %s1239_s13 }
 0x4d3   :  { %759 = vmatpush.bf16.msra.mxu1 %v1153_v27  ;;  %v1528_v27 = vld [vmem:[%s1675_s10] ss:$0 sm:$0xff]  ;;  %s1240_s10 = smov 8  }
 0x4d7   :  { %760 = vmatpush.bf16.msra.mxu1 %v1152_v55 }
 0x4db   :  { %761 = vmatpush.bf16.msra.mxu1 %v1151_v8 }
 0x53c   :  { %v490_v41 = vpop.permute.xlu1 %489 }
 0x53d   :  { %v499_v29 = vsel %vm185_vm1, %v1347_v20, %v490_v41 }
 0x544   :  { %v497_v30 = vpop.permute.xlu1 %496 }
 0x545   :  { %v501_v63 = vsel %vm500_vm5, %v499_v29, %v497_v30 }
 0x546   :  { %v502_v2 = vpack.c.bf16 %v501_v63, %v501_v63 }
 0x548   :  { %1137 = vmatmul.msk.bf16.vlgmr.msrb.gmra.mxu1 %vm542_vm6, %v502_v2 }
 0x54d   :  { %v222_v13 = vpop.f32.mrf.mxu2 }
 0x54e   :  { %v223_v31 = vadd.f32 %v1355_v23, %v222_v13 }
 0x550   :  { %v1534_v36 = vmax.f32 %v223_v31, 0.0 }
 0x555   :  { %v224_v35 = vpop.f32.mrf.mxu2 }
 0x556   :  { %v225_v37 = vadd.f32 %v1355_v23, %v224_v35  ;;  %v288_v23 = vadd.f32 %v1384_v46, %v287_v47 }
 0x558   :  { %v234_v39 = vmax.f32 %v225_v37, 0.0 }
 0x55a   :  { %v238_v43 = vpack.c.bf16 %v234_v39, %v1534_v36 }
 0x55c   :  { %1102 = vmatmul.msk.bf16.gmra.mxu3 %vm185_vm1, %v238_v43 }
 0x5c5   :  { %v555_v32 = vpop.f32.mrf.mxu1 }
 0x5c6   :  { %v556_v33 = vadd.f32 %v1528_v27, %v555_v32 }
 0x5c8   :  { %v1532_v20 = vmax.f32 %v556_v33, 0.0 }
 0x5ca   :  { %v560_v38 = vpack.c.bf16 %v1532_v20, %v1532_v20 }
 0x5cc   :  { %1138 = vmatmul.msk.bf16.vlgmr.msra.gmra.mxu0 %vm185_vm1, %v560_v38 }
 0x5cd   :  { %v557_v45 = vpop.f32.mrf.mxu1 }
 0x649   :  { %v573_v48 = vpop.f32.mrf.mxu0 }
 0x64a   :  { %v578_v50 = vrot.slane %v573_v48, 1  ;;  %v579_v52 = vperm.slane %v573_v48, 0 }
 0x64c   :  { %v580_v53 = vperm.slane %v578_v50, 0  ;;  %v583_v59 = vadd.f32 %v579_v52, %v278_v49 }
 0x64e   :  { %v584_v60 = vadd.f32 %v580_v53, %v288_v23  ;;  %v585_v61 = vmax.f32 %v583_v59, 0.0 }
 0x650   :  { %v587_v62 = vmul.f32 %v1390_v51, %v585_v61  ;;  %v586_v1 = vmax.f32 %v584_v60, 0.0 }
 0x651   :  { %v575_v4 = vpop.f32.mrf.mxu0 }
 0x652   :  { %v589_v58 = vsel %vm185_vm1, %v587_v62, 0.0  ;;  %v588_v6 = vmul.f32 %v1390_v51, %v586_v1 }
 0x653   :  { %590 = vadd.xlane.f32.xlu1 %v589_v58 }
 0x654   :  { %v592_v7 = vsel %vm185_vm1, %v588_v6, 0.0 }
 0x655   :  { %593 = vadd.xlane.f32.xlu2 %v592_v7 }
 0x6c6   :  { %v1549_v54 = vpop.xlane.xlu1 %590 }
 0x6c7   :  { %v597_v11 = vperm.slane %v1549_v54, %v1407_v5 }
 0x6c8   :  { %v1551_v10 = vpop.xlane.xlu2 %593 }
 0x6c9   :  { %v598_v12 = vperm.slane %v1551_v10, %v1407_v5 }
 0x6cb   :  { %v599_v0 = vsel %vm350_vm2, %v598_v12, %v597_v11 }
 0x6cc   :  { %v601_v15 = vsel %vm353_vm3, %v599_v0, -inf }
 0x6cd   :  { %602 = vmax.xlane.f32.xlu2 %v601_v15 }
 0x740   :  { %v603_v16 = vpop.xlane.xlu2 %602 }
 0x741   :  { %v605_v17 = vperm.slane %v603_v16, 0  ;;  %v606_v18 = vperm.slane %v603_v16, 1 }
 0x743   :  { %vm610_vm7 = vcmp.eq.f32.partialorder %v1551_v10, %v606_v18  ;;  %vm609_vm8 = vcmp.eq.f32.partialorder %v1549_v54, %v605_v17 }
 0x744   :  { %v612_v19 = vsel %vm610_vm7, %v1417_v14, 8  ;;  %v611_v21 = vsel %vm609_vm8, %v1417_v14, 8 }
 0x745   :  { %617 = vperm.xlu2 %1173, %v612_v19   ;;  %614 = vperm.xlu0 %1180, %v611_v21   ;;  %v670_v21 = vsel %vm185_vm1, %v1361_v28, 0.0 }
 0x74d   :  { %1191 = vset.pattern.permute.xlu0 %v1403_v3 }
 0x79f   :  { %v618_v22 = vpop.permute.xlu2 %617 }
 0x7a0   :  { %v620_v8 = vperm.slane %v618_v22, %v1407_v5  ;;  %v677_v22 = vsel %vm185_vm1, %v1376_v42, 0.0 }
 0x7b7   :  { %v615_v55 = vpop.permute.xlu0 %614 }
 0x7b8   :  { %v619_v24 = vperm.slane %v615_v55, %v1407_v5  ;;  %v671_v55 = vrot.slane %v670_v21, 4 }
 0x7ba   :  { %v621_v25 = vsel %vm350_vm2, %v620_v8, %v619_v24  ;;  %v678_v8 = vrot.slane %v677_v22, 4 }
 0x7bb   :  { %v622_v26 = vsel %vm353_vm3, %v621_v25, 2147483647  ;;  %v672_v25 = vadd.f32 %v671_v55, %v670_v21 }
 0x7bc   :  { %v624_v41 = vshra.s32 %v622_v26, 16  ;;  %v623_v30 = vand.u32 65535, %v622_v26  ;;  %v679_v26 = vadd.f32 %v678_v8, %v677_v22 }
 0x7be   :  { %v626_v29 = vcvt.s32.f32 %v624_v41  ;;  %v625_v2 = vcvt.s32.f32 %v623_v30  ;;  %v673_v30 = vrot.slane %v672_v25, 2 }
 0x7c0   :  { %627 = vmin.xlane.f32.xlu0 %v626_v29 }
 0x833   :  { %v628_v63 = vpop.xlane.xlu0 %627 }
 0x834   :  { %vm629_vm9 = vcmp.eq.f32.partialorder %v626_v29, %v628_v63  ;;  %v634_v3 = vcvt.f32.s32 %v628_v63  ;;  %v680_v63 = vrot.slane %v679_v26, 2 }
 0x835   :  { %v630_v13 = vsel %vm629_vm9, %v625_v2, inf }
 0x836   :  { %631 = vmin.xlane.f32.xlu1 %v630_v13  ;;  %v635_v32 = vshll.u32 %v634_v3, 16  ;;  %v674_v13 = vadd.f32 %v673_v30, %v672_v25  ;;  %v681_v3 = vadd.f32 %v680_v63, %v679_v26 }
 0x8a9   :  { %v632_v31 = vpop.xlane.xlu1 %631 }
 0x8aa   :  { %v633_v33 = vcvt.f32.s32 %v632_v31 }
 0x8ac   :  { %v636_v35 = vadd.s32 %v635_v32, %v633_v33 }
 0x8ae   :  { %vm637_vm10 = vcmp.eq.s32.totalorder %v1407_v5, %v636_v35  ;;  %v682_v35 = vrot.slane %v681_v3, 1 }
 0x8af   :  { %v1139_v37 = vsel %vm637_vm10, 1.0, %v1237_v40 }
 0x8b0   :  { %v686_v38 = vsub.f32 1.0, %v1139_v37  ;;  %v640_v45 = vperm.slane %v1139_v37, 0  ;;  %v647_v47 = vperm.slane %v1139_v37, 1 }
 0x8b2   :  { %688 = vrot.lane.b32.xlu2 %v686_v38, %s1240_s10  ;;  %v1181_v48 = vpack.i.bf16 %v640_v45, %v647_v47 }
 0x90c   :  { %v689_v39 = vpop.permute.xlu2 %688 }
 0x90d   :  { %v691_v43 = vmul.f32 %v689_v39, %v1430_v44 }
 0x90f   :  { %693 = vrot.lane.b32.xlu1 %v691_v43, %s1241_s19 }
 0x917   :  { %1182 = vperm.xlu1 %1172, %v1181_v48  }
 0x981   :  { %v694_v49 = vpop.permute.xlu1 %693 }
 0x982   :  { %v696_v50 = vsel %vm353_vm3, %v694_v49, 0.0 }
 0x983   :  { %697 = vadd.xlane.f32.xlu2 %v696_v50  ;;  %v683_v50 = vadd.f32 %v682_v35, %v681_v3 }
 0x989   :  { %v1183_v52 = vpop.permute.xlu1 %1182 }
 0x98a   :  { %v1185_v23 = vunpack.i.h.bf16 %v1183_v52  ;;  %v1184_v53 = vunpack.i.l.bf16 %v1183_v52 }
 0x98c   :  { %v654_v59 = vmul.f32 %v1185_v23, %v1361_v28  ;;  %v655_v60 = vmul.f32 %v1184_v53, %v1376_v42  ;;  %v675_v42 = vrot.slane %v674_v13, 1 }
 0x98e   :  { %v656_v61 = vsel %vm185_vm1, %v654_v59, 0.0  ;;  %v663_v62 = vsel %vm185_vm1, %v655_v60, 0.0  ;;  %v676_v59 = vadd.f32 %v675_v42, %v674_v13 }
 0x98f   :  { %v657_v1 = vrot.slane %v656_v61, 4  ;;  %v664_v4 = vrot.slane %v663_v62, 4 }
 0x991   :  { %v658_v58 = vadd.f32 %v657_v1, %v656_v61  ;;  %v665_v6 = vadd.f32 %v664_v4, %v663_v62 }
 0x993   :  { %v659_v7 = vrot.slane %v658_v58, 2  ;;  %v666_v11 = vrot.slane %v665_v6, 2 }
 0x995   :  { %v660_v12 = vadd.f32 %v659_v7, %v658_v58  ;;  %v667_v0 = vadd.f32 %v666_v11, %v665_v6 }
 0x997   :  { %v661_v15 = vrot.slane %v660_v12, 1  ;;  %v668_v16 = vrot.slane %v667_v0, 1 }
 0x999   :  { %v662_v17 = vadd.f32 %v661_v15, %v660_v12  ;;  %v669_v18 = vadd.f32 %v668_v16, %v667_v0 }
 0x99b   :  { %v737_v19 = vsel %vm350_vm2, %v669_v18, %v662_v17  ;;  %v685_v61 = vsub.f32 %v683_v50, %v669_v18  ;;  %v684_v58 = vsub.f32 %v676_v59, %v662_v17 }
 0x99c   :  { %738 = vrot.lane.b32.xlu0 %v737_v19, %s1238_s4 }
 0x9f6   :  { %v698_v24 = vpop.xlane.xlu2 %697 }
 0x9f7   :  { %vm699_vm11 = vcmp.gt.f32.partialorder %v698_v24, 0.0 }
 0x9f8   :  { %v700_v41 = vsel %vm699_vm11, %v698_v24, 1.0 }
 0x9f9   :  { %v702_v29 = vrot.slane %v700_v41, 1  ;;  %1200 = vrcp.f32 %v700_v41  ;;  %vm710_vm13 = vweird.f32 %v700_v41  ;;  %v716_v39 = vand.u32 2147483648, %v700_v41 }
 0x9fa   :  { %v714_v43 = vand.u32 2147483647, %v700_v41 }
 0x9fb   :  { %1202 = vrcp.f32 %v702_v29  ;;  %v731_v45 = vand.u32 2147483648, %v702_v29  ;;  %v729_v49 = vand.u32 2147483647, %v702_v29  ;;  %vm725_vm4 = vweird.f32 %v702_v29 }
 0x9fc   :  { %v717_v53 = vor.u32 1.1754944e-38, %v716_v39  ;;  %vm715_vm8 = vcmp.eq.f32.partialorder %v714_v43, 8.507059e+37 }
 0x9fd   :  { %v732_v60 = vor.u32 1.1754944e-38, %v731_v45  ;;  %vm730_vm9 = vcmp.eq.f32.partialorder %v729_v49, 8.507059e+37 }
 0x9ff   :  { %v1201_v2 = vpop.eup %1200 }
 0xa00   :  { %v706_v31 = vmul.f32 %v1201_v2, %v700_v41  ;;  %vm711_vm12 = vweird.f32 %v1201_v2  ;;  %v290_v41 = vpop.f32.mrf.mxu3 }
 0xa01   :  { %v1203_v28 = vpop.eup %1202  ;;  %vm712_vm15 = vmor %vm710_vm13, %vm711_vm12 }
 0xa02   :  { %v707_v32 = vsub.f32 1.0, %v706_v31  ;;  %v721_v33 = vmul.f32 %v1203_v28, %v702_v29  ;;  %vm726_vm14 = vweird.f32 %v1203_v28  ;;  %v291_v29 = vadd.f32 %v1384_v46, %v290_v41 }
 0xa03   :  { %vm727_vm7 = vmor %vm725_vm4, %vm726_vm14 }
 0xa04   :  { %v708_v37 = vmul.f32 %v1201_v2, %v707_v32  ;;  %v722_v38 = vsub.f32 1.0, %v721_v33 }
 0xa06   :  { %v709_v47 = vadd.f32 %v1201_v2, %v708_v37  ;;  %v723_v48 = vmul.f32 %v1203_v28, %v722_v38 }
 0xa08   :  { %v713_v52 = vsel %vm712_vm15, %v1201_v2, %v709_v47  ;;  %v724_v23 = vadd.f32 %v1203_v28, %v723_v48 }
 0xa09   :  { %v718_v1 = vsel %vm715_vm8, %v717_v53, %v713_v52 }
 0xa0a   :  { %v728_v62 = vsel %vm727_vm7, %v1203_v28, %v724_v23  ;;  %v719_v7 = vmul.f32 %v718_v1, %v684_v58 }
 0xa0b   :  { %v733_v4 = vsel %vm730_vm9, %v732_v60, %v728_v62 }
 0xa0c   :  { %v734_v6 = vmul.f32 %v733_v4, %v685_v61 }
 0xa0e   :  { %v743_v11 = vrot.slane %v734_v6, 7  ;;  %v739_v0 = vpop.permute.xlu0 %738 }
 0xa0f   :  { %v748_v15 = vsel %vm185_vm1, %v1532_v20, %v739_v0  ;;  %v281_v20 = vadd.f32 %v1384_v46, %v1396_v56 }
 0xa10   :  { %v744_v12 = vsel %vm350_vm2, %v743_v11, %v719_v7 }
 0xa11   :  { %745 = vrot.lane.b32.xlu1 %v744_v12, %s1239_s13 }
 0xa83   :  { %v746_v16 = vpop.permute.xlu1 %745 }
 0xa84   :  { %v749_v18 = vsel %vm500_vm5, %v748_v15, %v746_v16 }
 0xa85   :  { %v750_v19 = vpack.c.bf16 %v749_v18, %v749_v18 }
 0xa87   :  { %1140 = vmatmul.msk.bf16.vlgmr.msra.gmra.mxu1 %vm542_vm6, %v750_v19 }
 0xb04   :  { %v763_v21 = vpop.f32.mrf.mxu1 }
 0xb05   :  { %v764_v17 = vadd.f32 %v1528_v27, %v763_v21 }
 0xb07   :  { %v1589_v22 = vmax.f32 %v764_v17, 0.0 }
 0xb09   :  { %v768_v55 = vpack.c.bf16 %v1589_v22, %v1589_v22 }
 0xb0b   :  { %1141 = vmatmul.msk.bf16.vlgmr.msrb.gmra.mxu0 %vm185_vm1, %v768_v55 }
 0xb0c   :  { %v765_v8 = vpop.f32.mrf.mxu1 }
 0xb88   :  { %v781_v24 = vpop.f32.mrf.mxu0 }
 0xb89   :  { %v786_v25 = vrot.slane %v781_v24, 1  ;;  %v787_v26 = vperm.slane %v781_v24, 0 }
 0xb8b   :  { %v788_v30 = vperm.slane %v786_v25, 0  ;;  %v791_v63 = vadd.f32 %v787_v26, %v281_v20 }
 0xb8d   :  { %v792_v2 = vadd.f32 %v788_v30, %v291_v29  ;;  %v793_v13 = vmax.f32 %v791_v63, 0.0 }
 0xb8f   :  { %v795_v3 = vmul.f32 %v1390_v51, %v793_v13  ;;  %v794_v31 = vmax.f32 %v792_v2, 0.0 }
 0xb90   :  { %v783_v28 = vpop.f32.mrf.mxu0 }
 0xb91   :  { %v797_v32 = vsel %vm185_vm1, %v795_v3, 0.0  ;;  %v796_v33 = vmul.f32 %v1390_v51, %v794_v31 }
 0xb92   :  { %798 = vadd.xlane.f32.xlu1 %v797_v32 }
 0xb93   :  { %v800_v56 = vsel %vm185_vm1, %v796_v33, 0.0 }
 0xb94   :  { %801 = vadd.xlane.f32.xlu2 %v800_v56 }
 0xc05   :  { %v1601_v42 = vpop.xlane.xlu1 %798 }
 0xc06   :  { %v805_v46 = vperm.slane %v1601_v42, %v1407_v5 }
 0xc07   :  { %v1603_v35 = vpop.xlane.xlu2 %801 }
 0xc08   :  { %v806_v37 = vperm.slane %v1603_v35, %v1407_v5 }
 0xc0a   :  { %v807_v38 = vsel %vm350_vm2, %v806_v37, %v805_v46 }
 0xc0b   :  { %v809_v39 = vsel %vm353_vm3, %v807_v38, -inf  ;;  %v878_v38 = vsel %vm185_vm1, %v1368_v34, 0.0 }
 0xc0c   :  { %810 = vmax.xlane.f32.xlu0 %v809_v39  ;;  %v885_v39 = vsel %vm185_vm1, %v1534_v36, 0.0 }
 0xc7f   :  { %v811_v51 = vpop.xlane.xlu0 %810 }
 0xc80   :  { %v813_v43 = vperm.slane %v811_v51, 0  ;;  %v814_v47 = vperm.slane %v811_v51, 1  ;;  %v879_v51 = vrot.slane %v878_v38, 4 }
 0xc82   :  { %vm817_vm10 = vcmp.eq.f32.partialorder %v1601_v42, %v813_v43  ;;  %vm818_vm11 = vcmp.eq.f32.partialorder %v1603_v35, %v814_v47  ;;  %v886_v43 = vrot.slane %v885_v39, 4  ;;  %v880_v47 = vadd.f32 %v879_v51, %v878_v38 }
 0xc83   :  { %v819_v45 = vsel %vm817_vm10, %v1417_v14, 8  ;;  %v820_v48 = vsel %vm818_vm11, %v1417_v14, 8 }
 0xc84   :  { %822 = vperm.xlu2 %1173, %v819_v45  }
 0xc8c   :  { %825 = vperm.xlu2 %1173, %v820_v48   ;;  %v887_v48 = vadd.f32 %v886_v43, %v885_v39 }
 0xcde   :  { %v823_v49 = vpop.permute.xlu2 %822 }
 0xcdf   :  { %v827_v52 = vperm.slane %v823_v49, %v1407_v5 }
 0xce6   :  { %v826_v50 = vpop.permute.xlu2 %825 }
 0xce7   :  { %v828_v23 = vperm.slane %v826_v50, %v1407_v5 }
 0xce9   :  { %v829_v53 = vsel %vm350_vm2, %v828_v23, %v827_v52  ;;  %v881_v52 = vrot.slane %v880_v47, 2  ;;  %v888_v23 = vrot.slane %v887_v48, 2 }
 0xcea   :  { %v830_v59 = vsel %vm353_vm3, %v829_v53, 2147483647 }
 0xceb   :  { %v832_v60 = vshra.s32 %v830_v59, 16  ;;  %v831_v62 = vand.u32 65535, %v830_v59  ;;  %v882_v59 = vadd.f32 %v881_v52, %v880_v47 }
 0xced   :  { %v834_v61 = vcvt.s32.f32 %v832_v60  ;;  %v833_v4 = vcvt.s32.f32 %v831_v62  ;;  %v889_v60 = vadd.f32 %v888_v23, %v887_v48 }
 0xcef   :  { %835 = vmin.xlane.f32.xlu1 %v834_v61 }
 0xd62   :  { %v836_v1 = vpop.xlane.xlu1 %835 }
 0xd63   :  { %vm837_vm12 = vcmp.eq.f32.partialorder %v834_v61, %v836_v1  ;;  %v842_v14 = vcvt.f32.s32 %v836_v1 }
 0xd64   :  { %v838_v58 = vsel %vm837_vm12, %v833_v4, inf  ;;  %v890_v4 = vrot.slane %v889_v60, 1 }
 0xd65   :  { %839 = vmin.xlane.f32.xlu2 %v838_v58  ;;  %v843_v7 = vshll.u32 %v842_v14, 16 }
 0xdd8   :  { %v840_v6 = vpop.xlane.xlu2 %839 }
 0xdd9   :  { %v841_v11 = vcvt.f32.s32 %v840_v6 }
 0xddb   :  { %v844_v12 = vadd.s32 %v843_v7, %v841_v11 }
 0xddd   :  { %vm845_vm13 = vcmp.eq.s32.totalorder %v1407_v5, %v844_v12 }
 0xdde   :  { %v1142_v0 = vsel %vm845_vm13, 1.0, %v1237_v40 }
 0xddf   :  { %v894_v15 = vsub.f32 1.0, %v1142_v0  ;;  %v848_v16 = vperm.slane %v1142_v0, 0  ;;  %v855_v18 = vperm.slane %v1142_v0, 1 }
 0xde1   :  { %896 = vrot.lane.b32.xlu1 %v894_v15, %s1242_s20  ;;  %v1186_v19 = vpack.i.bf16 %v848_v16, %v855_v18  ;;  %v891_v16 = vadd.f32 %v890_v4, %v889_v60  ;;  %v1011_v60 = vadd.s32 4294967288, %v1407_v5 }
 0xde9   :  { %1187 = vperm.xlu1 %1172, %v1186_v19  }
 0xe53   :  { %v897_v21 = vpop.permute.xlu1 %896 }
 0xe54   :  { %v899_v17 = vmul.f32 %v897_v21, %v1430_v44 }
 0xe56   :  { %901 = vrot.lane.b32.xlu0 %v899_v17, %s1243_s21 }
 0xe5b   :  { %v1188_v55 = vpop.permute.xlu1 %1187 }
 0xe5c   :  { %v1190_v8 = vunpack.i.h.bf16 %v1188_v55  ;;  %v1189_v24 = vunpack.i.l.bf16 %v1188_v55 }
 0xe5e   :  { %v862_v20 = vmul.f32 %v1190_v8, %v1368_v34  ;;  %v863_v25 = vmul.f32 %v1189_v24, %v1534_v36  ;;  %v883_v36 = vrot.slane %v882_v59, 1 }
 0xe60   :  { %v864_v40 = vsel %vm185_vm1, %v862_v20, 0.0  ;;  %v871_v26 = vsel %vm185_vm1, %v863_v25, 0.0  ;;  %v884_v17 = vadd.f32 %v883_v36, %v882_v59  ;;  %v1023_v36 = vadd.s32 4294967272, %v1407_v5 }
 0xe61   :  { %v865_v41 = vrot.slane %v864_v40, 4  ;;  %v872_v29 = vrot.slane %v871_v26, 4 }
 0xe63   :  { %v866_v30 = vadd.f32 %v865_v41, %v864_v40  ;;  %v873_v63 = vadd.f32 %v872_v29, %v871_v26 }
 0xe65   :  { %v867_v2 = vrot.slane %v866_v30, 2  ;;  %v874_v13 = vrot.slane %v873_v63, 2 }
 0xe67   :  { %v868_v44 = vadd.f32 %v867_v2, %v866_v30  ;;  %v875_v3 = vadd.f32 %v874_v13, %v873_v63 }
 0xe69   :  { %v869_v31 = vrot.slane %v868_v44, 1  ;;  %v876_v28 = vrot.slane %v875_v3, 1 }
 0xe6b   :  { %v870_v32 = vadd.f32 %v869_v31, %v868_v44  ;;  %v877_v33 = vadd.f32 %v876_v28, %v875_v3 }
 0xe6d   :  { %v945_v56 = vsel %vm350_vm2, %v877_v33, %v870_v32  ;;  %v893_v8 = vsub.f32 %v891_v16, %v877_v33  ;;  %v892_v40 = vsub.f32 %v884_v17, %v870_v32 }
 0xe6e   :  { %946 = vrot.lane.b32.xlu1 %v945_v56, %s1238_s4 }
 0xec8   :  { %v902_v46 = vpop.permute.xlu0 %901 }
 0xec9   :  { %v904_v37 = vsel %vm353_vm3, %v902_v46, 0.0  ;;  %v292_v46 = vpop.f32.mrf.mxu3 }
 0xeca   :  { %905 = vadd.xlane.f32.xlu0 %v904_v37 }
 0xee0   :  { %v947_v63 = vpop.permute.xlu1 %946 }
 0xee1   :  { %v956_v2 = vsel %vm185_vm1, %v1589_v22, %v947_v63  ;;  %v1208_v22 = vld [vmem:[%s1672_s7] ss:$0 sm:$0xff]  ;;  %s1244_s7 = smov [#allocation2]  }
 0xee2   :  { %v283_v38 = vadd.f32 %v1208_v22, %v1398_v57  ;;  %v293_v43 = vadd.f32 %v1208_v22, %v292_v46 }
 0xf3d   :  { %v906_v45 = vpop.xlane.xlu0 %905 }
 0xf3e   :  { %vm907_vm14 = vcmp.gt.f32.partialorder %v906_v45, 0.0 }
 0xf3f   :  { %v908_v49 = vsel %vm907_vm14, %v906_v45, 1.0 }
 0xf40   :  { %v910_v50 = vrot.slane %v908_v49, 1  ;;  %1204 = vrcp.f32 %v908_v49  ;;  %vm918_vm15 = vweird.f32 %v908_v49  ;;  %v922_v6 = vand.u32 2147483647, %v908_v49 }
 0xf41   :  { %v924_v7 = vand.u32 2147483648, %v908_v49 }
 0xf42   :  { %1206 = vrcp.f32 %v910_v50  ;;  %v939_v11 = vand.u32 2147483648, %v910_v50  ;;  %v937_v15 = vand.u32 2147483647, %v910_v50  ;;  %vm933_vm8 = vweird.f32 %v910_v50 }
 0xf43   :  { %v925_v21 = vor.u32 1.1754944e-38, %v924_v7  ;;  %vm923_vm10 = vcmp.eq.f32.partialorder %v922_v6, 8.507059e+37 }
 0xf44   :  { %v940_v55 = vor.u32 1.1754944e-38, %v939_v11  ;;  %vm938_vm11 = vcmp.eq.f32.partialorder %v937_v15, 8.507059e+37 }
 0xf46   :  { %v1205_v53 = vpop.eup %1204 }
 0xf47   :  { %v914_v61 = vmul.f32 %v1205_v53, %v908_v49  ;;  %vm919_vm3 = vweird.f32 %v1205_v53  ;;  %v1209_v49 = vld [vmem:[%s1673_s8] ss:$0 sm:$0xff]  ;;  %s1040_s8 = sshll.u32 %s1244_s7, 4  ;;  %s1041_s8 = int_to_ptr.vmem [resolvable:$true] %s1040_s8 }
 0xf48   :  { %v1207_v34 = vpop.eup %1206  ;;  %vm920_vm7 = vmor %vm918_vm15, %vm919_vm3 }
 0xf49   :  { %v915_v62 = vsub.f32 1.0, %v914_v61  ;;  %v929_v1 = vmul.f32 %v1207_v34, %v910_v50  ;;  %vm934_vm4 = vweird.f32 %v1207_v34  ;;  %v1016_v61 = vadd.s32 4294967280, %v1407_v5 }
 0xf4a   :  { %vm935_vm9 = vmor %vm933_vm8, %vm934_vm4 }
 0xf4b   :  { %v916_v58 = vmul.f32 %v1205_v53, %v915_v62  ;;  %v930_v14 = vsub.f32 1.0, %v929_v1  ;;  %v1018_v62 = vperm.slane %v1603_v35, %v1016_v61  ;;  %v1012_v1 = vperm.slane %v1549_v54, %v1011_v60 }
 0xf4c   :  { %v1017_v4 = vperm.slane %v1601_v42, %v1016_v61 }
 0xf4d   :  { %v917_v12 = vadd.f32 %v1205_v53, %v916_v58  ;;  %v931_v0 = vmul.f32 %v1207_v34, %v930_v14 }
 0xf4e   :  { %v1019_v6 = vsel %vm350_vm2, %v1018_v62, %v1017_v4 }
 0xf4f   :  { %v921_v18 = vsel %vm920_vm7, %v1205_v53, %v917_v12  ;;  %v932_v19 = vadd.f32 %v1207_v34, %v931_v0 }
 0xf50   :  { %v926_v20 = vsel %vm923_vm10, %v925_v21, %v921_v18 }
 0xf51   :  { %v936_v24 = vsel %vm935_vm9, %v1207_v34, %v932_v19  ;;  %v927_v41 = vmul.f32 %v926_v20, %v892_v40  ;;  %v1013_v34 = vperm.slane %v1551_v10, %v1011_v60 }
 0xf52   :  { %v941_v25 = vsel %vm938_vm11, %v940_v55, %v936_v24 }
 0xf53   :  { %v942_v26 = vmul.f32 %v941_v25, %v893_v8  ;;  %v1014_v14 = vsel %vm350_vm2, %v1013_v34, %v1012_v1 }
 0xf55   :  { %v951_v29 = vrot.slane %v942_v26, 7 }
 0xf57   :  { %v952_v30 = vsel %vm350_vm2, %v951_v29, %v927_v41 }
 0xf58   :  { %953 = vrot.lane.b32.xlu2 %v952_v30, %s1239_s13 }
 0xfb2   :  { %v954_v13 = vpop.permute.xlu2 %953 }
 0xfb3   :  { %v957_v44 = vsel %vm500_vm5, %v956_v2, %v954_v13  ;;  %vm1028_vm5 = vcmask 64512  }
 0xfb4   :  { %v958_v3 = vpack.c.bf16 %v957_v44, %v957_v44  ;;  %v1029_v5 = vsel %vm1028_vm5, %v1412_v9, %v1014_v14 }
 0xfb5   :  { %v1030_v42 = vsel %vm99_vm0, %v1029_v5, %v1019_v6 }
 0xfb6   :  { %1143 = vmatmul.msk.bf16.vlgmr.msrb.gmra.mxu2 %vm542_vm6, %v958_v3  ;;  %vm1033_vm6 = vcmask 254976  }
0x1039   :  { %v971_v31 = vpop.f32.mrf.mxu2 }
0x103a   :  { %v972_v28 = vadd.f32 %v1528_v27, %v971_v31 }
0x103c   :  { %v975_v32 = vmax.f32 %v972_v28, 0.0 }
0x103e   :  { %v976_v33 = vpack.c.bf16 %v975_v32, %v975_v32 }
0x1040   :  { %1144 = vmatmul.msk.bf16.vlgmr.msrb.gmra.mxu3 %vm185_vm1, %v976_v33 }
0x1041   :  { %v973_v56 = vpop.f32.mrf.mxu2 }
0x10c3   :  { %v989_v37 = vpop.f32.mrf.mxu3 }
0x10c4   :  { %v994_v39 = vrot.slane %v989_v37, 1  ;;  %v995_v51 = vperm.slane %v989_v37, 0 }
0x10c6   :  { %v996_v45 = vperm.slane %v994_v39, 0  ;;  %v999_v47 = vadd.f32 %v995_v51, %v283_v38 }
0x10c8   :  { %v1000_v48 = vadd.f32 %v996_v45, %v293_v43  ;;  %v1001_v27 = vmax.f32 %v999_v47, 0.0 }
0x10ca   :  { %v1003_v50 = vmul.f32 %v1209_v49, %v1001_v27  ;;  %v1002_v52 = vmax.f32 %v1000_v48, 0.0 }
0x10cb   :  { %v991_v23 = vpop.f32.mrf.mxu3 }
0x10cc   :  { %v1005_v53 = vsel %vm185_vm1, %v1003_v50, 0.0  ;;  %v1004_v59 = vmul.f32 %v1209_v49, %v1002_v52 }
0x10cd   :  { %1006 = vadd.xlane.f32.xlu1 %v1005_v53 }
0x10ce   :  { %v1008_v57 = vsel %vm185_vm1, %v1004_v59, 0.0  ;;  %vm1031_vm1 = vcmask 195584  }
0x10cf   :  { %1009 = vadd.xlane.f32.xlu2 %v1008_v57 }
0x1140   :  { %v1007_v58 = vpop.xlane.xlu1 %1006 }
0x1141   :  { %v1024_v10 = vperm.slane %v1007_v58, %v1023_v36 }
0x1142   :  { %v1010_v7 = vpop.xlane.xlu2 %1009 }
0x1143   :  { %v1025_v35 = vperm.slane %v1010_v7, %v1023_v36 }
0x1145   :  { %v1026_v54 = vsel %vm350_vm2, %v1025_v35, %v1024_v10 }
0x1146   :  { %v1032_v11 = vsel %vm1031_vm1, %v1030_v42, %v1026_v54 }
0x1147   :  { %1034 = vst.msk [vmem:[#allocation2] sm:$0x3] %vm1033_vm6, %v1032_v11 }
0x1148   :  { %1045 = dma.vmem_to_hbm [thread:$0]  %s1041_s8, 32, %s1043_s2, [#allocation3]  }
0x1149   :  { %1234 = dma.done.wait [#allocation3], 32  }
0x114a   :  { %1235 = vsyncadd [#allocation3], 4294967264 }
0x114b   :  { %1050 = vsyncpa [#allocation3], 1 }

</bundles_post_ra>
